<compile_context>
chip_gen: v7x
topology: tpu7x:2x2x1
jax: 0.10.0
libtpu: 0.0.40
codegen_flags: <defaults>
</compile_context>

<pallas_src>
import math

import jax
import jax.numpy as jnp
from jax import lax
from jax.experimental import pallas as pl
from jax.experimental.pallas import tpu as pltpu

BN_EPS = 1e-5


def _round_up(v, m):
    return (v + m - 1) // m * m


def _make_kernel(H, W, B, Cq, has_proj):
    HW = H * W
    BHW = B * HW
    taps = [(dy, dx) for dy in (-1, 0, 1) for dx in (-1, 0, 1)]

    def kernel(*refs):
        if has_proj:
            (mask_ref, x_ref, w1_ref, b1_ref, w2_ref, b2_ref,
             wsc_ref, bsc_ref, out_ref, col_ref) = refs
        else:
            (mask_ref, x_ref, w1_ref, b1_ref, w2_ref, b2_ref,
             out_ref, col_ref) = refs

        x_bf = x_ref[0]                         # (Cq, BHW) bf16
        x_f32 = x_bf.astype(jnp.float32)

        def stage_im2col(a_f32):
            # Stack the 9 shifted + masked taps into the contraction dim.
            # Rolls are XLU lane rotations; mask kills out-of-image taps,
            # cross-image bleed and the roll wrap-around.
            for k, (dy, dx) in enumerate(taps):
                d = dy * W + dx
                if d == 0:
                    col = a_f32
                else:
                    col = (pltpu.roll(a_f32, shift=(-d) % BHW, axis=1)
                           * mask_ref[k])
                col_ref[k * Cq:(k + 1) * Cq, :] = col.astype(jnp.bfloat16)

        def conv3x3(w_ref, b_ref):
            # One (Cq, 9*Cq) @ (9*Cq, BHW) bf16 matmul, f32 accumulation;
            # bias = folded BN shift.
            return jnp.dot(w_ref[...], col_ref[...],
                           preferred_element_type=jnp.float32) + b_ref[...]

        # ---- conv1 (+ folded bn1) + relu1 ----
        stage_im2col(x_f32)
        o1 = jnp.maximum(conv3x3(w1_ref, b1_ref), 0.0)

        # ---- shortcut: 1x1 projection (+ folded bn) or identity ----
        if has_proj:
            sc = jnp.dot(wsc_ref[...], x_bf,
                         preferred_element_type=jnp.float32) + bsc_ref[...]
        else:
            sc = x_f32

        # ---- conv2 (+ folded bn2) ----
        stage_im2col(o1)
        o2 = conv3x3(w2_ref, b2_ref)

        # ---- residual add + relu2 ----
        out_ref[0] = jnp.maximum(o2 + sc, 0.0)

    return kernel


def _fold_bn(gamma, beta, mean, var):
    scale = gamma / jnp.sqrt(var + BN_EPS)
    bias = beta - mean * scale
    return scale, bias


def _fold_conv3x3(w_hwio, scale, cq):
    # (3,3,Cin,Cout) + per-Cout BN scale -> (Cq, 9*Cq) bf16; column block k
    # (tap k = (dy+1)*3 + (dx+1)) matches the im2col row order.
    kh, kw, cin, cout = w_hwio.shape
    w = jnp.transpose(w_hwio, (3, 0, 1, 2)) * scale[:, None, None, None]
    w = w.reshape(cout, kh * kw, cin)
    w = jnp.pad(w, ((0, cq - cout), (0, 0), (0, cq - cin)))
    return w.reshape(cq, kh * kw * cq).astype(jnp.bfloat16)


def _pad_bias(b, cq):
    return jnp.pad(b, (0, cq - b.shape[0])).reshape(cq, 1).astype(jnp.float32)


def _make_masks(H, W, B):
    # (9, 1, B*H*W) f32 boundary masks for the packed-batch flat layout.
    pos = jnp.arange(H * W)
    yy, xx = pos // W, pos % W
    ms = []
    for dy in (-1, 0, 1):
        for dx in (-1, 0, 1):
            ms.append(((xx + dx >= 0) & (xx + dx < W) &
                       (yy + dy >= 0) & (yy + dy < H)).astype(jnp.float32))
    m = jnp.tile(jnp.stack(ms), (1, B))          # (9, B*HW)
    return m.reshape(9, 1, B * H * W)


def _choose_images_per_step(n, hw, max_lanes=4096):
    # Prefer the widest lane slab that still leaves an even number of grid
    # steps (both v7x TensorCores busy); fall back to the widest slab.
    divs = [d for d in range(1, n + 1) if n % d == 0 and d * hw <= max_lanes]
    if not divs:
        return 1
    even = [d for d in divs if (n // d) % 2 == 0]
    return max(even) if even else max(divs)


def basic_block_forward(x_nchw, params, images_per_step=None):
    """Fused BasicBlock forward (stride=1).  x: (N,Cin,H,W) f32 -> (N,Cp,H,W)."""
    x = x_nchw.astype(jnp.float32)
    N, Cin, H, W = x.shape
    Cp = params["w1_hwio"].shape[-1]
    HW = H * W
    Cq = _round_up(max(Cin, Cp), 16)        # bf16 sublane tile is (16, 128)
    has_proj = params["wsc_hwio"] is not None

    # TODO(synk): stride>1 (downsampling) BasicBlock variant not implemented;
    # this block instance uses stride=1.

    B = images_per_step or _choose_images_per_step(N, HW)
    assert N % B == 0
    steps = N // B
    BHW = B * HW

    # Fold BN (inference mode) into conv weights / bias at parameter-prep time.
    s1, b1 = _fold_bn(params["bn1_g"], params["bn1_b"],
                      params["bn1_m"], params["bn1_v"])
    s2, b2 = _fold_bn(params["bn2_g"], params["bn2_b"],
                      params["bn2_m"], params["bn2_v"])
    w1 = _fold_conv3x3(params["w1_hwio"], s1, Cq)          # (Cq, 9*Cq) bf16
    w2 = _fold_conv3x3(params["w2_hwio"], s2, Cq)
    b1 = _pad_bias(b1, Cq)
    b2 = _pad_bias(b2, Cq)
    masks = _make_masks(H, W, B)                           # (9, 1, BHW) f32

    # NCHW -> (steps, Cq, B*HW) bf16: channels in sublanes, batch*spatial
    # packed lane-dense.
    x_flat = jnp.pad(x.reshape(N, Cin, HW), ((0, 0), (0, Cq - Cin), (0, 0)))
    x_flat = (x_flat.reshape(steps, B, Cq, HW)
              .transpose(0, 2, 1, 3).reshape(steps, Cq, BHW)
              .astype(jnp.bfloat16))

    args = [masks, x_flat, w1, b1, w2, b2]
    if has_proj:
        ssc, bsc = _fold_bn(params["bnsc_g"], params["bnsc_b"],
                            params["bnsc_m"], params["bnsc_v"])
        wsc = params["wsc_hwio"][0, 0].T * ssc[:, None]     # (Cout, Cin)
        wsc = jnp.pad(wsc, ((0, Cq - wsc.shape[0]), (0, Cq - wsc.shape[1])))
        args += [wsc.astype(jnp.bfloat16), _pad_bias(bsc, Cq)]

    in_specs = [
        pl.BlockSpec((9, 1, BHW), lambda n: (0, 0, 0)),          # masks
        pl.BlockSpec((1, Cq, BHW), lambda n: (n, 0, 0)),         # x
        pl.BlockSpec((Cq, 9 * Cq), lambda n: (0, 0)),            # w1
        pl.BlockSpec((Cq, 1), lambda n: (0, 0)),                 # b1
        pl.BlockSpec((Cq, 9 * Cq), lambda n: (0, 0)),            # w2
        pl.BlockSpec((Cq, 1), lambda n: (0, 0)),                 # b2
    ]
    if has_proj:
        in_specs += [pl.BlockSpec((Cq, Cq), lambda n: (0, 0)),   # wsc
                     pl.BlockSpec((Cq, 1), lambda n: (0, 0))]    # bsc

    flops = N * HW * (2 * (2 * Cq * 9 * Cq) + (2 * Cq * Cq if has_proj else 0))
    bytes_accessed = int(sum(int(a.size) * a.dtype.itemsize for a in args)
                         + steps * Cq * BHW * 4)

    out_flat = pl.pallas_call(
        _make_kernel(H, W, B, Cq, has_proj),
        out_shape=jax.ShapeDtypeStruct((steps, Cq, BHW), jnp.float32),
        grid=(steps,),
        in_specs=in_specs,
        out_specs=pl.BlockSpec((1, Cq, BHW), lambda n: (n, 0, 0)),
        scratch_shapes=[pltpu.VMEM((9 * Cq, BHW), jnp.bfloat16)],
        compiler_params=pltpu.CompilerParams(
            dimension_semantics=("parallel",)),
        cost_estimate=pl.CostEstimate(flops=int(flops), transcendentals=0,
                                      bytes_accessed=bytes_accessed),
    )(*args)

    out = (out_flat.reshape(steps, Cq, B, HW)
           .transpose(0, 2, 1, 3).reshape(N, Cq, HW))
    return out[:, :Cp, :].reshape(N, Cp, H, W)


def basic_block_reference(x_nchw, params):
    """Pure-JAX f32 reference (XLA convs) for correctness checking."""
    x = jnp.transpose(x_nchw, (0, 2, 3, 1)).astype(jnp.float32)

    def conv(y, w_hwio, pad):
        return lax.conv_general_dilated(
            y, w_hwio, window_strides=(1, 1), padding=pad,
            dimension_numbers=("NHWC", "HWIO", "NHWC"))

    def bn(y, g, b, m, v):
        return (y - m) / jnp.sqrt(v + BN_EPS) * g + b

    out = jax.nn.relu(bn(conv(x, params["w1_hwio"], ((1, 1), (1, 1))),
                         params["bn1_g"], params["bn1_b"],
                         params["bn1_m"], params["bn1_v"]))
    out = bn(conv(out, params["w2_hwio"], ((1, 1), (1, 1))),
             params["bn2_g"], params["bn2_b"], params["bn2_m"], params["bn2_v"])
    if params["wsc_hwio"] is None:
        sc = x
    else:
        sc = bn(conv(x, params["wsc_hwio"], ((0, 0), (0, 0))),
                params["bnsc_g"], params["bnsc_b"],
                params["bnsc_m"], params["bnsc_v"])
    out = jax.nn.relu(out + sc)
    return jnp.transpose(out, (0, 3, 1, 2))


def init_params(key, in_planes, planes):
    """Deterministic synthetic parameters matching BasicBlock(in_planes, planes, stride=1)."""
    ks = jax.random.split(key, 12)

    def conv_w(k, cout, cin, kh, kw):
        fan_in = cin * kh * kw
        bound = 1.0 / math.sqrt(fan_in)
        w_oihw = jax.random.uniform(k, (cout, cin, kh, kw), jnp.float32, -bound, bound)
        return jnp.transpose(w_oihw, (2, 3, 1, 0))   # OIHW -> HWIO

    def bn_p(kg, kb, km, kv, c):
        g = jax.random.uniform(kg, (c,), jnp.float32, 0.5, 1.5)
        b = jax.random.normal(kb, (c,), jnp.float32) * 0.1
        m = jax.random.normal(km, (c,), jnp.float32) * 0.1
        v = jax.random.uniform(kv, (c,), jnp.float32, 0.5, 1.5)
        return g, b, m, v

    p = {}
    p["w1_hwio"] = conv_w(ks[0], planes, in_planes, 3, 3)
    p["bn1_g"], p["bn1_b"], p["bn1_m"], p["bn1_v"] = bn_p(ks[1], ks[2], ks[3], ks[4], planes)
    p["w2_hwio"] = conv_w(ks[5], planes, planes, 3, 3)
    p["bn2_g"], p["bn2_b"], p["bn2_m"], p["bn2_v"] = bn_p(ks[6], ks[7], ks[8], ks[9], planes)
    if in_planes != planes:   # stride fixed to 1 in this script
        p["wsc_hwio"] = conv_w(ks[10], planes, in_planes, 1, 1)
        p["bnsc_g"], p["bnsc_b"], p["bnsc_m"], p["bnsc_v"] = bn_p(
            *jax.random.split(ks[11], 4), planes)
    else:
        p["wsc_hwio"] = None
    return p


if __name__ == "__main__":
    key = jax.random.PRNGKey(0)
    k_x, k_p = jax.random.split(key)

    N, IN_PLANES, PLANES, H, W = 2, 4, 8, 16, 16
    x = jax.random.normal(k_x, (N, IN_PLANES, H, W), jnp.float32)
    params = init_params(k_p, IN_PLANES, PLANES)

    out = jax.block_until_ready(basic_block_forward(x, params))
    ref = jax.block_until_ready(basic_block_reference(x, params))

    assert out.shape == (N, PLANES, H, W), out.shape
    max_err = float(jnp.max(jnp.abs(out - ref)))
    # bf16 matmul operands (f32 accumulation) -> looser tolerance vs f32 ref.
    assert jnp.allclose(out, ref, atol=5e-2, rtol=5e-2), max_err
    print("KERNEL_OK")
</pallas_src>

<mosaic_0001>
module attributes {stable_mosaic.version = 11 : i64} {
  func.func @kernel(%arg0: i32, %arg1: memref<9x1x256xf32, #tpu.memory_space<vmem>>, %arg2: memref<1x16x256xbf16, #tpu.memory_space<vmem>>, %arg3: memref<16x144xbf16, #tpu.memory_space<vmem>>, %arg4: memref<16x1xf32, #tpu.memory_space<vmem>>, %arg5: memref<16x144xbf16, #tpu.memory_space<vmem>>, %arg6: memref<16x1xf32, #tpu.memory_space<vmem>>, %arg7: memref<16x16xbf16, #tpu.memory_space<vmem>>, %arg8: memref<16x1xf32, #tpu.memory_space<vmem>>, %arg9: memref<1x16x256xf32, #tpu.memory_space<vmem>>, %arg10: memref<144x256xbf16, #tpu.memory_space<vmem>>) attributes {dimension_semantics = [#tpu.dimension_semantics<parallel>], iteration_bounds = array<i64: 2>, scalar_prefetch = 0 : i64, scratch_operands = 1 : i64, tpu.core_type = #tpu.core_type<tc>, window_params = [{pipeline_mode = #tpu.pipeline_mode<synchronous>, transform_indices = @transform_0, window_bounds = array<i64: 9, 1, 256>}, {transform_indices = @transform_1, window_bounds = array<i64: 1, 16, 256>}, {pipeline_mode = #tpu.pipeline_mode<synchronous>, transform_indices = @transform_2, window_bounds = array<i64: 16, 144>}, {pipeline_mode = #tpu.pipeline_mode<synchronous>, transform_indices = @transform_3, window_bounds = array<i64: 16, 1>}, {pipeline_mode = #tpu.pipeline_mode<synchronous>, transform_indices = @transform_4, window_bounds = array<i64: 16, 144>}, {pipeline_mode = #tpu.pipeline_mode<synchronous>, transform_indices = @transform_5, window_bounds = array<i64: 16, 1>}, {pipeline_mode = #tpu.pipeline_mode<synchronous>, transform_indices = @transform_6, window_bounds = array<i64: 16, 16>}, {pipeline_mode = #tpu.pipeline_mode<synchronous>, transform_indices = @transform_7, window_bounds = array<i64: 16, 1>}, {transform_indices = @transform_8, window_bounds = array<i64: 1, 16, 256>}]} {
    %c0 = arith.constant 0 : index
    %c0_0 = arith.constant 0 : index
    %c0_1 = arith.constant 0 : index
    %0 = vector.load %arg2[%c0, %c0_0, %c0_1] : memref<1x16x256xbf16, #tpu.memory_space<vmem>>, vector<1x16x256xbf16>
    %1 = vector.shape_cast %0 : vector<1x16x256xbf16> to vector<16x256xbf16>
    %2 = arith.extf %1 : vector<16x256xbf16> to vector<16x256xf32>
    %c17_i32 = arith.constant 17 : i32
    %3 = tpu.dynamic_rotate %2 by %c17_i32 dim 1 : vector<16x256xf32>, i32 -> vector<16x256xf32>
    %c0_2 = arith.constant 0 : index
    %c0_3 = arith.constant 0 : index
    %c0_4 = arith.constant 0 : index
    %4 = vector.load %arg1[%c0_2, %c0_3, %c0_4] : memref<9x1x256xf32, #tpu.memory_space<vmem>>, vector<1x1x256xf32>
    %5 = vector.shape_cast %4 : vector<1x1x256xf32> to vector<1x256xf32>
    %6 = vector.broadcast %5 : vector<1x256xf32> to vector<16x256xf32>
    %7 = arith.mulf %3, %6 : vector<16x256xf32>
    %8 = arith.truncf %7 : vector<16x256xf32> to vector<16x256xbf16>
    %c0_5 = arith.constant 0 : index
    %c0_6 = arith.constant 0 : index
    %9 = vector.load %arg10[%c0_5, %c0_6] : memref<144x256xbf16, #tpu.memory_space<vmem>>, vector<16x256xbf16>
    tpu.vector_store %arg10[%c0_5, %c0_6], %8 {strides = array<i32>} : memref<144x256xbf16, #tpu.memory_space<vmem>>, vector<16x256xbf16>,
    %c16_i32 = arith.constant 16 : i32
    %10 = tpu.dynamic_rotate %2 by %c16_i32 dim 1 : vector<16x256xf32>, i32 -> vector<16x256xf32>
    %c1 = arith.constant 1 : index
    %c0_7 = arith.constant 0 : index
    %c0_8 = arith.constant 0 : index
    %11 = vector.load %arg1[%c1, %c0_7, %c0_8] : memref<9x1x256xf32, #tpu.memory_space<vmem>>, vector<1x1x256xf32>
    %12 = vector.shape_cast %11 : vector<1x1x256xf32> to vector<1x256xf32>
    %13 = vector.broadcast %12 : vector<1x256xf32> to vector<16x256xf32>
    %14 = arith.mulf %10, %13 : vector<16x256xf32>
    %15 = arith.truncf %14 : vector<16x256xf32> to vector<16x256xbf16>
    %c16 = arith.constant 16 : index
    %c0_9 = arith.constant 0 : index
    %16 = vector.load %arg10[%c16, %c0_9] : memref<144x256xbf16, #tpu.memory_space<vmem>>, vector<16x256xbf16>
    tpu.vector_store %arg10[%c16, %c0_9], %15 {strides = array<i32>} : memref<144x256xbf16, #tpu.memory_space<vmem>>, vector<16x256xbf16>,
    %c15_i32 = arith.constant 15 : i32
    %17 = tpu.dynamic_rotate %2 by %c15_i32 dim 1 : vector<16x256xf32>, i32 -> vector<16x256xf32>
    %c2 = arith.constant 2 : index
    %c0_10 = arith.constant 0 : index
    %c0_11 = arith.constant 0 : index
    %18 = vector.load %arg1[%c2, %c0_10, %c0_11] : memref<9x1x256xf32, #tpu.memory_space<vmem>>, vector<1x1x256xf32>
    %19 = vector.shape_cast %18 : vector<1x1x256xf32> to vector<1x256xf32>
    %20 = vector.broadcast %19 : vector<1x256xf32> to vector<16x256xf32>
    %21 = arith.mulf %17, %20 : vector<16x256xf32>
    %22 = arith.truncf %21 : vector<16x256xf32> to vector<16x256xbf16>
    %c32 = arith.constant 32 : index
    %c0_12 = arith.constant 0 : index
    %23 = vector.load %arg10[%c32, %c0_12] : memref<144x256xbf16, #tpu.memory_space<vmem>>, vector<16x256xbf16>
    tpu.vector_store %arg10[%c32, %c0_12], %22 {strides = array<i32>} : memref<144x256xbf16, #tpu.memory_space<vmem>>, vector<16x256xbf16>,
    %c1_i32 = arith.constant 1 : i32
    %24 = tpu.dynamic_rotate %2 by %c1_i32 dim 1 : vector<16x256xf32>, i32 -> vector<16x256xf32>
    %c3 = arith.constant 3 : index
    %c0_13 = arith.constant 0 : index
    %c0_14 = arith.constant 0 : index
    %25 = vector.load %arg1[%c3, %c0_13, %c0_14] : memref<9x1x256xf32, #tpu.memory_space<vmem>>, vector<1x1x256xf32>
    %26 = vector.shape_cast %25 : vector<1x1x256xf32> to vector<1x256xf32>
    %27 = vector.broadcast %26 : vector<1x256xf32> to vector<16x256xf32>
    %28 = arith.mulf %24, %27 : vector<16x256xf32>
    %29 = arith.truncf %28 : vector<16x256xf32> to vector<16x256xbf16>
    %c48 = arith.constant 48 : index
    %c0_15 = arith.constant 0 : index
    %30 = vector.load %arg10[%c48, %c0_15] : memref<144x256xbf16, #tpu.memory_space<vmem>>, vector<16x256xbf16>
    tpu.vector_store %arg10[%c48, %c0_15], %29 {strides = array<i32>} : memref<144x256xbf16, #tpu.memory_space<vmem>>, vector<16x256xbf16>,
    %31 = arith.truncf %2 : vector<16x256xf32> to vector<16x256xbf16>
    %c64 = arith.constant 64 : index
    %c0_16 = arith.constant 0 : index
    %32 = vector.load %arg10[%c64, %c0_16] : memref<144x256xbf16, #tpu.memory_space<vmem>>, vector<16x256xbf16>
    tpu.vector_store %arg10[%c64, %c0_16], %31 {strides = array<i32>} : memref<144x256xbf16, #tpu.memory_space<vmem>>, vector<16x256xbf16>,
    %c255_i32 = arith.constant 255 : i32
    %33 = tpu.dynamic_rotate %2 by %c255_i32 dim 1 : vector<16x256xf32>, i32 -> vector<16x256xf32>
    %c5 = arith.constant 5 : index
    %c0_17 = arith.constant 0 : index
    %c0_18 = arith.constant 0 : index
    %34 = vector.load %arg1[%c5, %c0_17, %c0_18] : memref<9x1x256xf32, #tpu.memory_space<vmem>>, vector<1x1x256xf32>
    %35 = vector.shape_cast %34 : vector<1x1x256xf32> to vector<1x256xf32>
    %36 = vector.broadcast %35 : vector<1x256xf32> to vector<16x256xf32>
    %37 = arith.mulf %33, %36 : vector<16x256xf32>
    %38 = arith.truncf %37 : vector<16x256xf32> to vector<16x256xbf16>
    %c80 = arith.constant 80 : index
    %c0_19 = arith.constant 0 : index
    %39 = vector.load %arg10[%c80, %c0_19] : memref<144x256xbf16, #tpu.memory_space<vmem>>, vector<16x256xbf16>
    tpu.vector_store %arg10[%c80, %c0_19], %38 {strides = array<i32>} : memref<144x256xbf16, #tpu.memory_space<vmem>>, vector<16x256xbf16>,
    %c241_i32 = arith.constant 241 : i32
    %40 = tpu.dynamic_rotate %2 by %c241_i32 dim 1 : vector<16x256xf32>, i32 -> vector<16x256xf32>
    %c6 = arith.constant 6 : index
    %c0_20 = arith.constant 0 : index
    %c0_21 = arith.constant 0 : index
    %41 = vector.load %arg1[%c6, %c0_20, %c0_21] : memref<9x1x256xf32, #tpu.memory_space<vmem>>, vector<1x1x256xf32>
    %42 = vector.shape_cast %41 : vector<1x1x256xf32> to vector<1x256xf32>
    %43 = vector.broadcast %42 : vector<1x256xf32> to vector<16x256xf32>
    %44 = arith.mulf %40, %43 : vector<16x256xf32>
    %45 = arith.truncf %44 : vector<16x256xf32> to vector<16x256xbf16>
    %c96 = arith.constant 96 : index
    %c0_22 = arith.constant 0 : index
    %46 = vector.load %arg10[%c96, %c0_22] : memref<144x256xbf16, #tpu.memory_space<vmem>>, vector<16x256xbf16>
    tpu.vector_store %arg10[%c96, %c0_22], %45 {strides = array<i32>} : memref<144x256xbf16, #tpu.memory_space<vmem>>, vector<16x256xbf16>,
    %c240_i32 = arith.constant 240 : i32
    %47 = tpu.dynamic_rotate %2 by %c240_i32 dim 1 : vector<16x256xf32>, i32 -> vector<16x256xf32>
    %c7 = arith.constant 7 : index
    %c0_23 = arith.constant 0 : index
    %c0_24 = arith.constant 0 : index
    %48 = vector.load %arg1[%c7, %c0_23, %c0_24] : memref<9x1x256xf32, #tpu.memory_space<vmem>>, vector<1x1x256xf32>
    %49 = vector.shape_cast %48 : vector<1x1x256xf32> to vector<1x256xf32>
    %50 = vector.broadcast %49 : vector<1x256xf32> to vector<16x256xf32>
    %51 = arith.mulf %47, %50 : vector<16x256xf32>
    %52 = arith.truncf %51 : vector<16x256xf32> to vector<16x256xbf16>
    %c112 = arith.constant 112 : index
    %c0_25 = arith.constant 0 : index
    %53 = vector.load %arg10[%c112, %c0_25] : memref<144x256xbf16, #tpu.memory_space<vmem>>, vector<16x256xbf16>
    tpu.vector_store %arg10[%c112, %c0_25], %52 {strides = array<i32>} : memref<144x256xbf16, #tpu.memory_space<vmem>>, vector<16x256xbf16>,
    %c239_i32 = arith.constant 239 : i32
    %54 = tpu.dynamic_rotate %2 by %c239_i32 dim 1 : vector<16x256xf32>, i32 -> vector<16x256xf32>
    %c8 = arith.constant 8 : index
    %c0_26 = arith.constant 0 : index
    %c0_27 = arith.constant 0 : index
    %55 = vector.load %arg1[%c8, %c0_26, %c0_27] : memref<9x1x256xf32, #tpu.memory_space<vmem>>, vector<1x1x256xf32>
    %56 = vector.shape_cast %55 : vector<1x1x256xf32> to vector<1x256xf32>
    %57 = vector.broadcast %56 : vector<1x256xf32> to vector<16x256xf32>
    %58 = arith.mulf %54, %57 : vector<16x256xf32>
    %59 = arith.truncf %58 : vector<16x256xf32> to vector<16x256xbf16>
    %c128 = arith.constant 128 : index
    %c0_28 = arith.constant 0 : index
    %60 = vector.load %arg10[%c128, %c0_28] : memref<144x256xbf16, #tpu.memory_space<vmem>>, vector<16x256xbf16>
    tpu.vector_store %arg10[%c128, %c0_28], %59 {strides = array<i32>} : memref<144x256xbf16, #tpu.memory_space<vmem>>, vector<16x256xbf16>,
    %c0_29 = arith.constant 0 : index
    %c0_30 = arith.constant 0 : index
    %61 = vector.load %arg3[%c0_29, %c0_30] : memref<16x144xbf16, #tpu.memory_space<vmem>>, vector<16x144xbf16>
    %c0_31 = arith.constant 0 : index
    %c0_32 = arith.constant 0 : index
    %62 = vector.load %arg10[%c0_31, %c0_32] : memref<144x256xbf16, #tpu.memory_space<vmem>>, vector<144x256xbf16>
    %cst = arith.constant dense<0.000000e+00> : vector<16x256xf32>
    %63 = tpu.matmul %61, %62, %cst {dimension_numbers = #tpu.dot_dimension_numbers<[1], [0], [0], [1], [0, 0, 1, 1], [], []>} : vector<16x144xbf16>, vector<144x256xbf16>, vector<16x256xf32> -> vector<16x256xf32>
    %c0_33 = arith.constant 0 : index
    %c0_34 = arith.constant 0 : index
    %64 = vector.load %arg4[%c0_33, %c0_34] : memref<16x1xf32, #tpu.memory_space<vmem>>, vector<16x1xf32>
    %65 = vector.broadcast %64 : vector<16x1xf32> to vector<16x256xf32>
    %66 = arith.addf %63, %65 : vector<16x256xf32>
    %cst_35 = arith.constant 0.000000e+00 : f32
    %67 = vector.broadcast %cst_35 : f32 to vector<16x256xf32>
    %68 = arith.maximumf %66, %67 : vector<16x256xf32>
    %c0_36 = arith.constant 0 : index
    %c0_37 = arith.constant 0 : index
    %69 = vector.load %arg7[%c0_36, %c0_37] : memref<16x16xbf16, #tpu.memory_space<vmem>>, vector<16x16xbf16>
    %cst_38 = arith.constant dense<0.000000e+00> : vector<16x256xf32>
    %70 = tpu.matmul %69, %1, %cst_38 {dimension_numbers = #tpu.dot_dimension_numbers<[1], [0], [0], [1], [0, 0, 1, 1], [], []>} : vector<16x16xbf16>, vector<16x256xbf16>, vector<16x256xf32> -> vector<16x256xf32>
    %c0_39 = arith.constant 0 : index
    %c0_40 = arith.constant 0 : index
    %71 = vector.load %arg8[%c0_39, %c0_40] : memref<16x1xf32, #tpu.memory_space<vmem>>, vector<16x1xf32>
    %72 = vector.broadcast %71 : vector<16x1xf32> to vector<16x256xf32>
    %73 = arith.addf %70, %72 : vector<16x256xf32>
    %c17_i32_41 = arith.constant 17 : i32
    %74 = tpu.dynamic_rotate %68 by %c17_i32_41 dim 1 : vector<16x256xf32>, i32 -> vector<16x256xf32>
    %c0_42 = arith.constant 0 : index
    %c0_43 = arith.constant 0 : index
    %c0_44 = arith.constant 0 : index
    %75 = vector.load %arg1[%c0_42, %c0_43, %c0_44] : memref<9x1x256xf32, #tpu.memory_space<vmem>>, vector<1x1x256xf32>
    %76 = vector.shape_cast %75 : vector<1x1x256xf32> to vector<1x256xf32>
    %77 = vector.broadcast %76 : vector<1x256xf32> to vector<16x256xf32>
    %78 = arith.mulf %74, %77 : vector<16x256xf32>
    %79 = arith.truncf %78 : vector<16x256xf32> to vector<16x256xbf16>
    %c0_45 = arith.constant 0 : index
    %c0_46 = arith.constant 0 : index
    %80 = vector.load %arg10[%c0_45, %c0_46] : memref<144x256xbf16, #tpu.memory_space<vmem>>, vector<16x256xbf16>
    tpu.vector_store %arg10[%c0_45, %c0_46], %79 {strides = array<i32>} : memref<144x256xbf16, #tpu.memory_space<vmem>>, vector<16x256xbf16>,
    %c16_i32_47 = arith.constant 16 : i32
    %81 = tpu.dynamic_rotate %68 by %c16_i32_47 dim 1 : vector<16x256xf32>, i32 -> vector<16x256xf32>
    %c1_48 = arith.constant 1 : index
    %c0_49 = arith.constant 0 : index
    %c0_50 = arith.constant 0 : index
    %82 = vector.load %arg1[%c1_48, %c0_49, %c0_50] : memref<9x1x256xf32, #tpu.memory_space<vmem>>, vector<1x1x256xf32>
    %83 = vector.shape_cast %82 : vector<1x1x256xf32> to vector<1x256xf32>
    %84 = vector.broadcast %83 : vector<1x256xf32> to vector<16x256xf32>
    %85 = arith.mulf %81, %84 : vector<16x256xf32>
    %86 = arith.truncf %85 : vector<16x256xf32> to vector<16x256xbf16>
    %c16_51 = arith.constant 16 : index
    %c0_52 = arith.constant 0 : index
    %87 = vector.load %arg10[%c16_51, %c0_52] : memref<144x256xbf16, #tpu.memory_space<vmem>>, vector<16x256xbf16>
    tpu.vector_store %arg10[%c16_51, %c0_52], %86 {strides = array<i32>} : memref<144x256xbf16, #tpu.memory_space<vmem>>, vector<16x256xbf16>,
    %c15_i32_53 = arith.constant 15 : i32
    %88 = tpu.dynamic_rotate %68 by %c15_i32_53 dim 1 : vector<16x256xf32>, i32 -> vector<16x256xf32>
    %c2_54 = arith.constant 2 : index
    %c0_55 = arith.constant 0 : index
    %c0_56 = arith.constant 0 : index
    %89 = vector.load %arg1[%c2_54, %c0_55, %c0_56] : memref<9x1x256xf32, #tpu.memory_space<vmem>>, vector<1x1x256xf32>
    %90 = vector.shape_cast %89 : vector<1x1x256xf32> to vector<1x256xf32>
    %91 = vector.broadcast %90 : vector<1x256xf32> to vector<16x256xf32>
    %92 = arith.mulf %88, %91 : vector<16x256xf32>
    %93 = arith.truncf %92 : vector<16x256xf32> to vector<16x256xbf16>
    %c32_57 = arith.constant 32 : index
    %c0_58 = arith.constant 0 : index
    %94 = vector.load %arg10[%c32_57, %c0_58] : memref<144x256xbf16, #tpu.memory_space<vmem>>, vector<16x256xbf16>
    tpu.vector_store %arg10[%c32_57, %c0_58], %93 {strides = array<i32>} : memref<144x256xbf16, #tpu.memory_space<vmem>>, vector<16x256xbf16>,
    %c1_i32_59 = arith.constant 1 : i32
    %95 = tpu.dynamic_rotate %68 by %c1_i32_59 dim 1 : vector<16x256xf32>, i32 -> vector<16x256xf32>
    %c3_60 = arith.constant 3 : index
    %c0_61 = arith.constant 0 : index
    %c0_62 = arith.constant 0 : index
    %96 = vector.load %arg1[%c3_60, %c0_61, %c0_62] : memref<9x1x256xf32, #tpu.memory_space<vmem>>, vector<1x1x256xf32>
    %97 = vector.shape_cast %96 : vector<1x1x256xf32> to vector<1x256xf32>
    %98 = vector.broadcast %97 : vector<1x256xf32> to vector<16x256xf32>
    %99 = arith.mulf %95, %98 : vector<16x256xf32>
    %100 = arith.truncf %99 : vector<16x256xf32> to vector<16x256xbf16>
    %c48_63 = arith.constant 48 : index
    %c0_64 = arith.constant 0 : index
    %101 = vector.load %arg10[%c48_63, %c0_64] : memref<144x256xbf16, #tpu.memory_space<vmem>>, vector<16x256xbf16>
    tpu.vector_store %arg10[%c48_63, %c0_64], %100 {strides = array<i32>} : memref<144x256xbf16, #tpu.memory_space<vmem>>, vector<16x256xbf16>,
    %102 = arith.truncf %68 : vector<16x256xf32> to vector<16x256xbf16>
    %c64_65 = arith.constant 64 : index
    %c0_66 = arith.constant 0 : index
    %103 = vector.load %arg10[%c64_65, %c0_66] : memref<144x256xbf16, #tpu.memory_space<vmem>>, vector<16x256xbf16>
    tpu.vector_store %arg10[%c64_65, %c0_66], %102 {strides = array<i32>} : memref<144x256xbf16, #tpu.memory_space<vmem>>, vector<16x256xbf16>,
    %c255_i32_67 = arith.constant 255 : i32
    %104 = tpu.dynamic_rotate %68 by %c255_i32_67 dim 1 : vector<16x256xf32>, i32 -> vector<16x256xf32>
    %c5_68 = arith.constant 5 : index
    %c0_69 = arith.constant 0 : index
    %c0_70 = arith.constant 0 : index
    %105 = vector.load %arg1[%c5_68, %c0_69, %c0_70] : memref<9x1x256xf32, #tpu.memory_space<vmem>>, vector<1x1x256xf32>
    %106 = vector.shape_cast %105 : vector<1x1x256xf32> to vector<1x256xf32>
    %107 = vector.broadcast %106 : vector<1x256xf32> to vector<16x256xf32>
    %108 = arith.mulf %104, %107 : vector<16x256xf32>
    %109 = arith.truncf %108 : vector<16x256xf32> to vector<16x256xbf16>
    %c80_71 = arith.constant 80 : index
    %c0_72 = arith.constant 0 : index
    %110 = vector.load %arg10[%c80_71, %c0_72] : memref<144x256xbf16, #tpu.memory_space<vmem>>, vector<16x256xbf16>
    tpu.vector_store %arg10[%c80_71, %c0_72], %109 {strides = array<i32>} : memref<144x256xbf16, #tpu.memory_space<vmem>>, vector<16x256xbf16>,
    %c241_i32_73 = arith.constant 241 : i32
    %111 = tpu.dynamic_rotate %68 by %c241_i32_73 dim 1 : vector<16x256xf32>, i32 -> vector<16x256xf32>
    %c6_74 = arith.constant 6 : index
    %c0_75 = arith.constant 0 : index
    %c0_76 = arith.constant 0 : index
    %112 = vector.load %arg1[%c6_74, %c0_75, %c0_76] : memref<9x1x256xf32, #tpu.memory_space<vmem>>, vector<1x1x256xf32>
    %113 = vector.shape_cast %112 : vector<1x1x256xf32> to vector<1x256xf32>
    %114 = vector.broadcast %113 : vector<1x256xf32> to vector<16x256xf32>
    %115 = arith.mulf %111, %114 : vector<16x256xf32>
    %116 = arith.truncf %115 : vector<16x256xf32> to vector<16x256xbf16>
    %c96_77 = arith.constant 96 : index
    %c0_78 = arith.constant 0 : index
    %117 = vector.load %arg10[%c96_77, %c0_78] : memref<144x256xbf16, #tpu.memory_space<vmem>>, vector<16x256xbf16>
    tpu.vector_store %arg10[%c96_77, %c0_78], %116 {strides = array<i32>} : memref<144x256xbf16, #tpu.memory_space<vmem>>, vector<16x256xbf16>,
    %c240_i32_79 = arith.constant 240 : i32
    %118 = tpu.dynamic_rotate %68 by %c240_i32_79 dim 1 : vector<16x256xf32>, i32 -> vector<16x256xf32>
    %c7_80 = arith.constant 7 : index
    %c0_81 = arith.constant 0 : index
    %c0_82 = arith.constant 0 : index
    %119 = vector.load %arg1[%c7_80, %c0_81, %c0_82] : memref<9x1x256xf32, #tpu.memory_space<vmem>>, vector<1x1x256xf32>
    %120 = vector.shape_cast %119 : vector<1x1x256xf32> to vector<1x256xf32>
    %121 = vector.broadcast %120 : vector<1x256xf32> to vector<16x256xf32>
    %122 = arith.mulf %118, %121 : vector<16x256xf32>
    %123 = arith.truncf %122 : vector<16x256xf32> to vector<16x256xbf16>
    %c112_83 = arith.constant 112 : index
    %c0_84 = arith.constant 0 : index
    %124 = vector.load %arg10[%c112_83, %c0_84] : memref<144x256xbf16, #tpu.memory_space<vmem>>, vector<16x256xbf16>
    tpu.vector_store %arg10[%c112_83, %c0_84], %123 {strides = array<i32>} : memref<144x256xbf16, #tpu.memory_space<vmem>>, vector<16x256xbf16>,
    %c239_i32_85 = arith.constant 239 : i32
    %125 = tpu.dynamic_rotate %68 by %c239_i32_85 dim 1 : vector<16x256xf32>, i32 -> vector<16x256xf32>
    %c8_86 = arith.constant 8 : index
    %c0_87 = arith.constant 0 : index
    %c0_88 = arith.constant 0 : index
    %126 = vector.load %arg1[%c8_86, %c0_87, %c0_88] : memref<9x1x256xf32, #tpu.memory_space<vmem>>, vector<1x1x256xf32>
    %127 = vector.shape_cast %126 : vector<1x1x256xf32> to vector<1x256xf32>
    %128 = vector.broadcast %127 : vector<1x256xf32> to vector<16x256xf32>
    %129 = arith.mulf %125, %128 : vector<16x256xf32>
    %130 = arith.truncf %129 : vector<16x256xf32> to vector<16x256xbf16>
    %c128_89 = arith.constant 128 : index
    %c0_90 = arith.constant 0 : index
    %131 = vector.load %arg10[%c128_89, %c0_90] : memref<144x256xbf16, #tpu.memory_space<vmem>>, vector<16x256xbf16>
    tpu.vector_store %arg10[%c128_89, %c0_90], %130 {strides = array<i32>} : memref<144x256xbf16, #tpu.memory_space<vmem>>, vector<16x256xbf16>,
    %c0_91 = arith.constant 0 : index
    %c0_92 = arith.constant 0 : index
    %132 = vector.load %arg5[%c0_91, %c0_92] : memref<16x144xbf16, #tpu.memory_space<vmem>>, vector<16x144xbf16>
    %c0_93 = arith.constant 0 : index
    %c0_94 = arith.constant 0 : index
    %133 = vector.load %arg10[%c0_93, %c0_94] : memref<144x256xbf16, #tpu.memory_space<vmem>>, vector<144x256xbf16>
    %cst_95 = arith.constant dense<0.000000e+00> : vector<16x256xf32>
    %134 = tpu.matmul %132, %133, %cst_95 {dimension_numbers = #tpu.dot_dimension_numbers<[1], [0], [0], [1], [0, 0, 1, 1], [], []>} : vector<16x144xbf16>, vector<144x256xbf16>, vector<16x256xf32> -> vector<16x256xf32>
    %c0_96 = arith.constant 0 : index
    %c0_97 = arith.constant 0 : index
    %135 = vector.load %arg6[%c0_96, %c0_97] : memref<16x1xf32, #tpu.memory_space<vmem>>, vector<16x1xf32>
    %136 = vector.broadcast %135 : vector<16x1xf32> to vector<16x256xf32>
    %137 = arith.addf %134, %136 : vector<16x256xf32>
    %138 = arith.addf %137, %73 : vector<16x256xf32>
    %cst_98 = arith.constant 0.000000e+00 : f32
    %139 = vector.broadcast %cst_98 : f32 to vector<16x256xf32>
    %140 = arith.maximumf %138, %139 : vector<16x256xf32>
    %c0_99 = arith.constant 0 : index
    %c0_100 = arith.constant 0 : index
    %c0_101 = arith.constant 0 : index
    %141 = vector.load %arg9[%c0_99, %c0_100, %c0_101] : memref<1x16x256xf32, #tpu.memory_space<vmem>>, vector<1x16x256xf32>
    %142 = vector.shape_cast %141 : vector<1x16x256xf32> to vector<16x256xf32>
    %143 = vector.shape_cast %140 : vector<16x256xf32> to vector<1x16x256xf32>
    tpu.vector_store %arg9[%c0_99, %c0_100, %c0_101], %143 {strides = array<i32>} : memref<1x16x256xf32, #tpu.memory_space<vmem>>, vector<1x16x256xf32>,
    return
  }
  func.func @transform_0(%arg0: i32) -> (i32, i32, i32) {
    %c0_i32 = arith.constant 0 : i32
    %c0_i32_0 = arith.constant 0 : i32
    %c0_i32_1 = arith.constant 0 : i32
    %c0_i32_2 = arith.constant 0 : i32
    return %c0_i32, %c0_i32_0, %c0_i32_1 : i32, i32, i32
  }
  func.func @transform_1(%arg0: i32) -> (i32, i32, i32) {
    %c0_i32 = arith.constant 0 : i32
    %c0_i32_0 = arith.constant 0 : i32
    %c0_i32_1 = arith.constant 0 : i32
    return %arg0, %c0_i32, %c0_i32_0 : i32, i32, i32
  }
  func.func @transform_2(%arg0: i32) -> (i32, i32) {
    %c0_i32 = arith.constant 0 : i32
    %c0_i32_0 = arith.constant 0 : i32
    %c0_i32_1 = arith.constant 0 : i32
    return %c0_i32, %c0_i32_0 : i32, i32
  }
  func.func @transform_3(%arg0: i32) -> (i32, i32) {
    %c0_i32 = arith.constant 0 : i32
    %c0_i32_0 = arith.constant 0 : i32
    %c0_i32_1 = arith.constant 0 : i32
    return %c0_i32, %c0_i32_0 : i32, i32
  }
  func.func @transform_4(%arg0: i32) -> (i32, i32) {
    %c0_i32 = arith.constant 0 : i32
    %c0_i32_0 = arith.constant 0 : i32
    %c0_i32_1 = arith.constant 0 : i32
    return %c0_i32, %c0_i32_0 : i32, i32
  }
  func.func @transform_5(%arg0: i32) -> (i32, i32) {
    %c0_i32 = arith.constant 0 : i32
    %c0_i32_0 = arith.constant 0 : i32
    %c0_i32_1 = arith.constant 0 : i32
    return %c0_i32, %c0_i32_0 : i32, i32
  }
  func.func @transform_6(%arg0: i32) -> (i32, i32) {
    %c0_i32 = arith.constant 0 : i32
    %c0_i32_0 = arith.constant 0 : i32
    %c0_i32_1 = arith.constant 0 : i32
    return %c0_i32, %c0_i32_0 : i32, i32
  }
  func.func @transform_7(%arg0: i32) -> (i32, i32) {
    %c0_i32 = arith.constant 0 : i32
    %c0_i32_0 = arith.constant 0 : i32
    %c0_i32_1 = arith.constant 0 : i32
    return %c0_i32, %c0_i32_0 : i32, i32
  }
  func.func @transform_8(%arg0: i32) -> (i32, i32, i32) {
    %c0_i32 = arith.constant 0 : i32
    %c0_i32_0 = arith.constant 0 : i32
    %c0_i32_1 = arith.constant 0 : i32
    return %arg0, %c0_i32, %c0_i32_0 : i32, i32, i32
  }
}

</mosaic_0001>

<bundles_post_ra>
// kernel: tpu_custom_call.1
= control target key start
LH: loop header
LB: loop body
LE: loop exit
PB: predicated region body
PF: predicated region fallthrough
CT: control target
= control target key end

     0   :  { %13 = vsyncpa [#allocation4], 0  ;;  %s2216_s0 = inlined_call_operand.vmem [shape: f32[9,1,256], index: 0, kind: input, shape index: {}]   ;;  %s2217_s1 = inlined_call_operand.vmem [shape: bf16[2,16,256], index: 1, kind: input, shape index: {}]   ;;  %s2218_s2 = inlined_call_operand.hbm [shape: bf16[16,144], index: 2, kind: input, shape index: {}]   ;;  %s2219_s3 = inlined_call_operand.vmem [shape: f32[16,1], index: 3, kind: input, shape index: {}]   ;;  %s2220_s4 = inlined_call_operand.vmem [shape: bf16[16,144], index: 4, kind: input, shape index: {}]   ;;  %s2221_s5 = inlined_call_operand.vmem [shape: f32[16,1], index: 5, kind: input, shape index: {}]   ;;  %s2222_s6 = inlined_call_operand.hbm [shape: bf16[16,16], index: 6, kind: input, shape index: {}]   ;;  %s2223_s7 = inlined_call_operand.vmem [shape: f32[16,1], index: 7, kind: input, shape index: {}]   ;;  %s2224_s8 = inlined_call_operand.hbm [shape: f32[2,16,256], index: 8, kind: output, shape index: {}]  }
   0x1   :  { %14 = vsyncpa [#allocation7], 0 }
   0x2   :  { %15 = vsyncpa [#allocation5], 0 }
   0x3   :  { %17 = vsyncpa [#allocation5 + $0x1], 0  ;;  %s1649_s27 = smov 0   ;;  %s1651_s28 = smov 0  }
   0x4   :  { %s1653_s29 = smov 0   ;;  %s1655_s30 = smov 0  }
   0x5 LB: > { %2229 = sst [smem:[#allocation12_spill]] %s1581_s29  ;;  %s1670_s9 = sadd.s32 4294967295, %s1585_s30   ;;  %s1585_s30 = sphi %s1655_s30, %s2246_s30   ;;  %s1581_s29 = sphi %s1653_s29, %s2243_s29   ;;  %s1577_s28 = sphi %s1651_s28, %s2245_s28   ;;  %s1573_s27 = sphi %s1649_s27, %s2244_s27  }
   0x6   : > { %s1240_s10 = sadd.s32 4294967294, %s1585_s30   ;;  %s1674_s11 = sadd.s32 1, %s1585_s30  }
   0x7   : > { %s203_s12 = sadd.s32 1, %s1581_s29  ;;  %s200_s13 = ssub.s32 %s1585_s30, %s1674_s11 }
   0x8   : > { %p213_p0 = scmp.ne.s32.totalorder %s1581_s29, %s1577_s28  ;;  %p201_p1 = scmp.eq.s32.totalorder %s200_s13, 0 }
   0x9   : > { %p214_p2 = scmp.eq.s32.totalorder %s1670_s9, 1  ;;  %p219_p3 = scmp.ne.s32.totalorder %s1577_s28, %s1573_s27 }
   0xa   : > { %p220_p4 = scmp.eq.s32.totalorder %s1240_s10, 1  ;;  %p1241_p7 = scmp.ge.s32.totalorder %s1585_s30, 1 }
   0xb   : > { %s1685_s14 = scalar_select %p201_p1, %s1581_s29, %s203_s12  }
   0xc   : > { %p1687_p5 = por %p214_p2, %p213_p0  ;;  %p1691_p6 = por %p220_p4, %p219_p3 }
   0xd   : > { %2230 = sst [smem:[#allocation13_spill]] %s1685_s14  ;;  %p227_p8 = scmp.lt.s32.totalorder %s1585_s30, 3 }
   0xe   : > { %s2231_s15 = scalar_select %p1687_p5, 1, 0 }
   0xf   : > { %s2232_s16 = scalar_select %p1691_p6, 1, 0 }
  0x10   : > { %p2225_p9 = scmp.eq.s32.totalorder %s1670_s9, 0  ;;  %p1698_p10 = pnand %p1241_p7, %p227_p8 }
  0x11   : > { %s1587_s18 = smov [#allocation3]   ;;  %s1588_s21 = smov [#allocation6]  }
  0x12   : > { %s2233_s17 = scalar_select %p1698_p10, 1, 0 }
  0x13   : > { %s242_s19 = sshll.u32 %s1587_s18, 4  ;;  %p1304_p11 = pneg %p1698_p10  ;;  %s243_s19 = int_to_ptr.vmem [resolvable:$true] %s242_s19 }
  0x14   : > { %s264_s22 = sshll.u32 %s1588_s21, 4  ;;  %s1459_s25 = scalar_lea.hbm %s2218_s2, 256  ;;  %s1710_s22 = int_to_ptr.vmem [resolvable:$true] %s264_s22 }
  0x15   : > { %p1706_p12 = pnand %p2225_p9, %p1304_p11  ;;  %p1460_p13 = scmp.ne.s32.totalorder %s2218_s2, %s1459_s25 }
  0x16   : > { %p1466_p3 = scmp.lt.u32.totalorder %s1459_s25, %s2218_s2 }
  0x17   : > { %p1461_p0 = pneg %p1706_p12 }
  0x19   : > { %p1462_p1 = pnand %p1461_p0, %p1460_p13 }
  0x1b   : > { %p1463_p2 = pneg %p1462_p1 }
  0x1d   : > { %p1468_p4 = pnand %p1466_p3, %p1463_p2 }
  0x1f   : > { %1471 = shalt.err (!%p1468_p4)
}
  0x20   : > { %s1472_s18 = scalar_lea.vmem %s243_s19, 256  ;;  %p1480_p9 = scmp.lt.s32.totalorder %s243_s19, %s243_s19 }
  0x21   : > { %p1473_p7 = scmp.ne.s32.totalorder %s243_s19, %s1472_s18  ;;  %p1481_p6 = scmp.lt.s32.totalorder %s1472_s18, %s1472_s18 }
  0x23   : > { %p1475_p8 = pnand %p1473_p7, %p1461_p0  ;;  %p1482_p5 = por %p1481_p6, %p1480_p9 }
  0x25   : > { %p1476_p11 = pneg %p1475_p8 }
  0x27   : > { %p1483_p10 = pnand %p1482_p5, %p1476_p11 }
  0x29   : > { %1486 = shalt.err (!%p1483_p10)
}
  0x2a   : > { %s1589_s21 = smov 128   ;;  %s1590_s23 = smov 8  }
  0x2b   : > { %1307 = dma.hbm_to_vmem [thread:$0]  (!%p1706_p12), %s2218_s2, 256, %s243_s19, [#allocation4], %s1589_s21, %s1589_s21, %s1590_s23  }
  0x2c   : > { %s1487_s12 = scalar_lea.hbm %s2222_s6, 128 }
  0x2d   : > { %p1488_p13 = scmp.ne.s32.totalorder %s2222_s6, %s1487_s12  ;;  %p1494_p9 = scmp.lt.u32.totalorder %s1487_s12, %s2222_s6 }
  0x2f   : > { %p1490_p5 = pnand %p1488_p13, %p1461_p0 }
  0x31   : > { %p1491_p6 = pneg %p1490_p5 }
  0x33   : > { %p1496_p10 = pnand %p1494_p9, %p1491_p6 }
  0x35   : > { %1499 = shalt.err (!%p1496_p10)
}
  0x36   : > { %s1500_s19 = scalar_lea.vmem %s1710_s22, 128  ;;  %p1508_p4 = scmp.lt.s32.totalorder %s1710_s22, %s1710_s22 }
  0x37   : > { %p1501_p1 = scmp.ne.s32.totalorder %s1710_s22, %s1500_s19  ;;  %p1509_p7 = scmp.lt.s32.totalorder %s1500_s19, %s1500_s19 }
  0x39   : > { %p1503_p2 = pnand %p1501_p1, %p1461_p0  ;;  %p1510_p8 = por %p1509_p7, %p1508_p4 }
  0x3b   : > { %p1504_p3 = pneg %p1503_p2 }
  0x3d   : > { %p1511_p11 = pnand %p1510_p8, %p1504_p3 }
  0x3f   : > { %1514 = shalt.err (!%p1511_p11)
}
  0x40   : > { %s1591_s29 = smov 64   ;;  %s1592_s14 = smov 4  }
  0x41   : > { %1310 = dma.hbm_to_vmem [thread:$0]  (!%p1706_p12), %s2222_s6, 128, %s1710_s22, [#allocation7], %s1591_s29, %s1591_s29, %s1592_s14  }
  0x42   : > { %p2235_p13 = scmp.ne.s32.totalorder %s2233_s17, 0 }
  0x43   : > { %p2236_p0 = scmp.eq.s32.totalorder (!%p2235_p13), %s1670_s9, 0 }
  0x44   : > { %291 = sbr.rel (%p2235_p13) target bundleno = 890 (0x37a), region = 52 }
  0x4b   : > { %1560 = dma.done.wait (%p2236_p0), [#allocation4], 256   ;;  %p2237_p5 = pmov %p2236_p0 }
  0x4c   : > { %p2238_p6 = pmov %p2236_p0 }
  0x4d   : > { %1562 = vsyncadd (%p2237_p5), [#allocation4], 4294967040 }
  0x4e   : > { %1564 = dma.done.wait (%p2238_p6), [#allocation7], 128   ;;  %p2239_p9 = pmov %p2236_p0 }
  0x4f   : > { %p329_p10 = scmp.lt.s32.totalorder %s1670_s9, 1  ;;  %s1593_s26 = smov 16   ;;  %v1454_v10 = vld [vmem:[#allocation3 + $0x4] ss:$8 sps:$4 sm:$0xff]   ;;  %vm667_vm0 = vcmask 130048   ;;  %v1601_v13 = vmov 0   ;;  %v349_v14 = vlaneseq }
  0x50   : > { %1566 = vsyncadd (%p2239_p9), [#allocation7], 4294967168  ;;  %s1594_s10 = smov 17   ;;  %s1595_s12 = smov 15   ;;  %1262 = vmatprep.mubr.msk.bf16.mxu0 %vm667_vm0, %v1454_v10  ;;  %v646_v11 = vld [vmem:[%s2219_s3] sm:$0xff]  ;;  %v647_v12 = vld [vmem:[%s2219_s3 + $0x8] sm:$0xff]  ;;  %1448 = vset.pattern.permute.xlu0 %v1601_v13 }
  0x51   : > { %s330_s20 = scalar_select %p329_p10, %s1670_s9, 1  ;;  %1449 = vset.pattern.permute.xlu1 %v1601_v13  ;;  %772 = vmatprep.mubr.bf16.mxu1 %v1601_v13  ;;  %v359_v15 = vshrl.u32 %v349_v14, 7  ;;  %v1803_v16 = vand.u32 127, %v349_v14  ;;  %v356_v19 = vld [vmem:[%s2216_s0] sm:$0x3] }
  0x52   : > { %s1596_s13 = smov 1   ;;  %s1597_s18 = smov 127   ;;  %v1251_v22 = vld [vmem:[%s2216_s0 + $0x2] sm:$0x3]  ;;  %v1252_v23 = vld [vmem:[%s2216_s0 + $0x4] sm:$0x3] }
  0x53   : > { %s1280_s22 = sshll.u32 %s330_s20, 4  ;;  %s1598_s19 = smov 113   ;;  %v1805_v17 = vsub.s32 1, %v359_v15  ;;  %v1807_v18 = vsub.s32 0, %v359_v15  ;;  %vm384_vm1 = vcmp.lt.s32.totalorder %v1803_v16, 16  ;;  %vm418_vm2 = vcmp.lt.s32.totalorder %v1803_v16, 15 }
  0x54   : > { %s333_s25 = scalar_lea.vmem %s2217_s1, %s1280_s22  ;;  %s1599_s29 = smov 112   ;;  %vm351_vm3 = vcmp.lt.s32.totalorder %v1803_v16, 17  ;;  %v1253_v29 = vld [vmem:[%s2216_s0 + $0x6] sm:$0x3]  ;;  %vm452_vm4 = vcmp.lt.s32.totalorder %v1803_v16, 1  ;;  %vm498_vm5 = vcmp.lt.s32.totalorder %v1803_v16, 127 }
  0x55   : > { %v335_v0 = vld [vmem:[%s333_s25] sm:$0xff]  ;;  %v336_v1 = vld [vmem:[%s333_s25 + $0x8] sm:$0xff]  ;;  %s1600_s14 = smov 111   ;;  %v365_v24 = vrot.slane %v356_v19, %v1805_v17  ;;  %v361_v27 = vrot.slane %v356_v19, %v1807_v18  ;;  %v399_v28 = vrot.slane %v1251_v22, %v1805_v17  ;;  %v395_v32 = vrot.slane %v1251_v22, %v1807_v18  ;;  %p2240_p1 = scmp.ne.s32.totalorder %s2231_s15, 0 }
  0x56   : > { %v337_v2 = vunpack.c.l.bf16 %v335_v0  ;;  %v339_v3 = vunpack.c.l.bf16 %v336_v1  ;;  %v338_v4 = vunpack.c.h.bf16 %v335_v0  ;;  %v340_v5 = vunpack.c.h.bf16 %v336_v1  ;;  %s1602_s20 = smov [#allocation8]  }
  0x57   : > { %v1782_v8 = vcombine.high %v335_v0, %v336_v1  ;;  %v1784_v9 = vcombine.low %v335_v0, %v336_v1  ;;  %v433_v33 = vrot.slane %v1252_v23, %v1805_v17  ;;  %v429_v34 = vrot.slane %v1252_v23, %v1807_v18 }
  0x58   : > { %v1378_v6 = vpack.i.bf16 %v339_v3, %v337_v2  ;;  %v1383_v7 = vpack.i.bf16 %v340_v5, %v338_v4  ;;  %v467_v41 = vrot.slane %v1253_v29, %v1805_v17  ;;  %v1833_v42 = vrot.slane %v1253_v29, %v1807_v18 }
  0x59   : > { %740 = vmatprep.subr.bf16.mxu1 %v1782_v8  ;;  %vm532_vm6 = vcmp.lt.s32.totalorder %v1803_v16, 113  ;;  %vm566_vm7 = vcmp.lt.s32.totalorder %v1803_v16, 112  ;;  %vm600_vm8 = vcmp.lt.s32.totalorder %v1803_v16, 111 }
  0x5a   : > { %1379 = vrot.lane.b32.xlu1 %v1378_v6, %s1593_s26  ;;  %1369 = vrot.lane.b32.xlu0 %v1378_v6, %s1594_s10 }
  0x5b   : > { %741 = vmatpush1.bf16.msra.mxu1 %v1784_v9 }
  0x5e   : > { %1384 = vrot.lane.b32.xlu1 %v1383_v7, %s1593_s26  ;;  %1374 = vrot.lane.b32.xlu0 %v1383_v7, %s1594_s10 }
  0x62   : > { %1394 = vrot.lane.b32.xlu1 %v1383_v7, %s1595_s12  ;;  %1389 = vrot.lane.b32.xlu0 %v1378_v6, %s1595_s12 }
  0x66   : > { %1404 = vrot.lane.b32.xlu1 %v1383_v7, %s1596_s13  ;;  %1399 = vrot.lane.b32.xlu0 %v1378_v6, %s1596_s13 }
  0x6a   : > { %1414 = vrot.lane.b32.xlu1 %v1383_v7, %s1597_s18  ;;  %1409 = vrot.lane.b32.xlu0 %v1378_v6, %s1597_s18 }
  0x6e   : > { %1424 = vrot.lane.b32.xlu1 %v1383_v7, %s1598_s19  ;;  %1419 = vrot.lane.b32.xlu0 %v1378_v6, %s1598_s19 }
  0x72   : > { %1434 = vrot.lane.b32.xlu1 %v1383_v7, %s1599_s29  ;;  %1429 = vrot.lane.b32.xlu0 %v1378_v6, %s1599_s29 }
  0x76   : > { %1444 = vrot.lane.b32.xlu1 %v1383_v7, %s1600_s14  ;;  %1439 = vrot.lane.b32.xlu0 %v1378_v6, %s1600_s14 }
  0x7a   : > { %650 = vperm.xlu0 %1448, %v646_v11   ;;  %655 = vperm.xlu1 %1449, %v647_v12  }
  0xcc   : > { %v1380_v20 = vpop.permute.xlu1 %1379  ;;  %v1370_v21 = vpop.permute.xlu0 %1369 }
  0xcd   : > { %v1382_v25 = vunpack.i.h.bf16 %v1380_v20  ;;  %v1381_v26 = vunpack.i.l.bf16 %v1380_v20  ;;  %v1372_v39 = vunpack.i.h.bf16 %v1370_v21  ;;  %v1371_v40 = vunpack.i.l.bf16 %v1370_v21 }
  0xd0   : > { %v1385_v30 = vpop.permute.xlu1 %1384  ;;  %v1375_v31 = vpop.permute.xlu0 %1374 }
  0xd1   : > { %v1387_v35 = vunpack.i.h.bf16 %v1385_v30  ;;  %v1386_v36 = vunpack.i.l.bf16 %v1385_v30  ;;  %v1377_v37 = vunpack.i.h.bf16 %v1375_v31  ;;  %v1376_v38 = vunpack.i.l.bf16 %v1375_v31  ;;  %v1256_v30 = vld [vmem:[%s2216_s0 + $0xa] sm:$0x3] }
  0xd3   : > { %v385_v43 = vsel %vm384_vm1, %v1381_v26, %v1386_v36  ;;  %v386_v44 = vsel %vm384_vm1, %v1382_v25, %v1387_v35  ;;  %v387_v45 = vsel %vm384_vm1, %v1386_v36, %v1381_v26  ;;  %v388_v46 = vsel %vm384_vm1, %v1387_v35, %v1382_v25 }
  0xd4   : > { %v1395_v47 = vpop.permute.xlu1 %1394  ;;  %v1390_v48 = vpop.permute.xlu0 %1389  ;;  %v352_v49 = vsel %vm351_vm3, %v1371_v40, %v1376_v38  ;;  %v353_v50 = vsel %vm351_vm3, %v1372_v39, %v1377_v37  ;;  %v354_v51 = vsel %vm351_vm3, %v1376_v38, %v1371_v40  ;;  %v355_v52 = vsel %vm351_vm3, %v1377_v37, %v1372_v39 }
  0xd5   : > { %v1397_v53 = vunpack.i.h.bf16 %v1395_v47  ;;  %v1396_v54 = vunpack.i.l.bf16 %v1395_v47  ;;  %v1392_v55 = vunpack.i.h.bf16 %v1390_v48  ;;  %v1391_v56 = vunpack.i.l.bf16 %v1390_v48 }
  0xd6   : > { %v369_v57 = vmul.f32 %v365_v24, %v352_v49  ;;  %v371_v58 = vmul.f32 %v365_v24, %v353_v50  ;;  %v368_v59 = vmul.f32 %v361_v27, %v354_v51  ;;  %v370_v60 = vmul.f32 %v361_v27, %v355_v52  ;;  %v1257_v52 = vld [vmem:[%s2216_s0 + $0xc] sm:$0x3] }
  0xd7   : > { %v420_v61 = vsel %vm418_vm2, %v1392_v55, %v1397_v53  ;;  %v422_v62 = vsel %vm418_vm2, %v1397_v53, %v1392_v55  ;;  %v419_v63 = vsel %vm418_vm2, %v1391_v56, %v1396_v54  ;;  %v421_v0 = vsel %vm418_vm2, %v1396_v54, %v1391_v56 }
  0xd8   : > { %v373_v1 = vpack.c.bf16 %v371_v58, %v369_v57  ;;  %v372_v2 = vpack.c.bf16 %v370_v60, %v368_v59  ;;  %v403_v3 = vmul.f32 %v399_v28, %v385_v43  ;;  %v405_v4 = vmul.f32 %v399_v28, %v386_v44  ;;  %v1405_v5 = vpop.permute.xlu1 %1404  ;;  %v1400_v6 = vpop.permute.xlu0 %1399 }
  0xd9   : > { %v1407_v7 = vunpack.i.h.bf16 %v1405_v5  ;;  %v1406_v10 = vunpack.i.l.bf16 %v1405_v5  ;;  %v1402_v11 = vunpack.i.h.bf16 %v1400_v6  ;;  %v1401_v12 = vunpack.i.l.bf16 %v1400_v6 }
  0xda   : > { %671 = vmatprep.subr.bf16.mxu0 %v373_v1  ;;  %v407_v13 = vpack.c.bf16 %v405_v4, %v403_v3  ;;  %v402_v14 = vmul.f32 %v395_v32, %v387_v45  ;;  %v404_v15 = vmul.f32 %v395_v32, %v388_v46  ;;  %v437_v19 = vmul.f32 %v433_v33, %v419_v63  ;;  %v1258_v63 = vld [vmem:[%s2216_s0 + $0xe] sm:$0x3] }
  0xdb   : > { %672 = vmatpush1.bf16.msra.mxu0 %v372_v2  ;;  %v454_v20 = vsel %vm452_vm4, %v1402_v11, %v1407_v7  ;;  %v456_v21 = vsel %vm452_vm4, %v1407_v7, %v1402_v11  ;;  %v453_v22 = vsel %vm452_vm4, %v1401_v12, %v1406_v10  ;;  %v455_v23 = vsel %vm452_vm4, %v1406_v10, %v1401_v12 }
  0xdc   : > { %673 = vmatprep.subr.bf16.mxu0 %v407_v13  ;;  %v406_v24 = vpack.c.bf16 %v404_v15, %v402_v14  ;;  %v439_v25 = vmul.f32 %v433_v33, %v420_v61  ;;  %v436_v26 = vmul.f32 %v429_v34, %v421_v0  ;;  %v438_v27 = vmul.f32 %v429_v34, %v422_v62  ;;  %v1415_v28 = vpop.permute.xlu1 %1414  ;;  %v1410_v29 = vpop.permute.xlu0 %1409 }
  0xdd   : > { %v1417_v31 = vunpack.i.h.bf16 %v1415_v28  ;;  %v1416_v32 = vunpack.i.l.bf16 %v1415_v28  ;;  %v1412_v35 = vunpack.i.h.bf16 %v1410_v29  ;;  %v1411_v36 = vunpack.i.l.bf16 %v1410_v29 }
  0xde   : > { %v441_v37 = vpack.c.bf16 %v439_v25, %v437_v19  ;;  %v471_v38 = vmul.f32 %v467_v41, %v453_v22  ;;  %v473_v39 = vmul.f32 %v467_v41, %v454_v20  ;;  %v440_v40 = vpack.c.bf16 %v438_v27, %v436_v26  ;;  %v1259_v26 = vld [vmem:[%s2216_s0 + $0x10] sm:$0x3] }
  0xdf   : > { %674 = vmatpush1.bf16.msra.mxu0 %v406_v24  ;;  %v502_v33 = vsel %vm498_vm5, %v1417_v31, %v1412_v35  ;;  %v513_v34 = vrot.slane %v1256_v30, %v1805_v17  ;;  %v501_v43 = vsel %vm498_vm5, %v1416_v32, %v1411_v36  ;;  %v470_v45 = vmul.f32 %v1833_v42, %v455_v23 }
  0xe0   : > { %675 = vmatprep.subr.bf16.mxu0 %v441_v37  ;;  %v475_v44 = vpack.c.bf16 %v473_v39, %v471_v38  ;;  %v472_v46 = vmul.f32 %v1833_v42, %v456_v21  ;;  %v1425_v47 = vpop.permute.xlu1 %1424  ;;  %v1420_v41 = vpop.permute.xlu0 %1419  ;;  %v500_v53 = vsel %vm498_vm5, %v1412_v35, %v1417_v31  ;;  %v509_v54 = vrot.slane %v1256_v30, %v1807_v18 }
  0xe1   : > { %v1427_v48 = vunpack.i.h.bf16 %v1425_v47  ;;  %v1426_v49 = vunpack.i.l.bf16 %v1425_v47  ;;  %v1422_v50 = vunpack.i.h.bf16 %v1420_v41  ;;  %v1421_v51 = vunpack.i.l.bf16 %v1420_v41 }
  0xe2   : > { %v499_v55 = vsel %vm498_vm5, %v1411_v36, %v1416_v32  ;;  %v474_v42 = vpack.c.bf16 %v472_v46, %v470_v45  ;;  %v517_v56 = vmul.f32 %v513_v34, %v501_v43  ;;  %v519_v57 = vmul.f32 %v513_v34, %v502_v33 }
  0xe3   : > { %676 = vmatpush1.bf16.msra.mxu0 %v440_v40  ;;  %v536_v58 = vsel %vm532_vm6, %v1427_v48, %v1422_v50  ;;  %v535_v59 = vsel %vm532_vm6, %v1426_v49, %v1421_v51  ;;  %v547_v62 = vrot.slane %v1257_v52, %v1805_v17  ;;  %v516_v4 = vmul.f32 %v509_v54, %v499_v55 }
  0xe4   : > { %677 = vmatprep.subr.bf16.mxu0 %v475_v44  ;;  %v1435_v60 = vpop.permute.xlu1 %1434  ;;  %v1430_v61 = vpop.permute.xlu0 %1429  ;;  %v518_v5 = vmul.f32 %v509_v54, %v500_v53  ;;  %v543_v6 = vrot.slane %v1257_v52, %v1807_v18  ;;  %v534_v7 = vsel %vm532_vm6, %v1422_v50, %v1427_v48  ;;  %v533_v10 = vsel %vm532_vm6, %v1421_v51, %v1426_v49  ;;  %v1452_v52 = vld [vmem:[#allocation3] ss:$8 sps:$4 sm:$0xff]  }
  0xe5   : > { %v1437_v0 = vunpack.i.h.bf16 %v1435_v60  ;;  %v1436_v1 = vunpack.i.l.bf16 %v1435_v60  ;;  %v1432_v2 = vunpack.i.h.bf16 %v1430_v61  ;;  %v1431_v3 = vunpack.i.l.bf16 %v1430_v61 }
  0xe6   : > { %v521_v11 = vpack.c.bf16 %v519_v57, %v517_v56  ;;  %v581_v12 = vrot.slane %v1258_v63, %v1805_v17  ;;  %v551_v20 = vmul.f32 %v547_v62, %v535_v59  ;;  %v553_v21 = vmul.f32 %v547_v62, %v536_v58 }
  0xe7   : > { %678 = vmatpush1.bf16.msra.mxu0 %v474_v42  ;;  %v570_v13 = vsel %vm566_vm7, %v1437_v0, %v1432_v2  ;;  %v569_v14 = vsel %vm566_vm7, %v1436_v1, %v1431_v3  ;;  %v520_v27 = vpack.c.bf16 %v518_v5, %v516_v4  ;;  %v550_v28 = vmul.f32 %v543_v6, %v533_v10  ;;  %v1455_v4 = vld [vmem:[#allocation6] sm:$0xff]   ;;  %v1456_v5 = vld [vmem:[%s2220_s4 + $0x4] ss:$8 sps:$4 sm:$0xff]  }
  0xe8   : > { %679 = vmatprep.subr.bf16.mxu0 %v1782_v8  ;;  %v1445_v15 = vpop.permute.xlu1 %1444  ;;  %v1440_v19 = vpop.permute.xlu0 %1439  ;;  %v577_v8 = vrot.slane %v1258_v63, %v1807_v18  ;;  %v552_v29 = vmul.f32 %v543_v6, %v534_v7  ;;  %v585_v30 = vmul.f32 %v581_v12, %v569_v14  ;;  %v587_v31 = vmul.f32 %v581_v12, %v570_v13  ;;  %v720_v6 = vld [vmem:[%s2223_s7] sm:$0xff]  ;;  %v721_v7 = vld [vmem:[%s2223_s7 + $0x8] sm:$0xff] }
  0xe9   : > { %v1447_v22 = vunpack.i.h.bf16 %v1445_v15  ;;  %v1446_v23 = vunpack.i.l.bf16 %v1445_v15  ;;  %v1442_v24 = vunpack.i.h.bf16 %v1440_v19  ;;  %v1441_v25 = vunpack.i.l.bf16 %v1440_v19  ;;  %1264 = vmatmul.mubr.msk.bf16.vlgmr.msra.gmra.mrb[0].mxu1 %vm667_vm0, %v1455_v4  ;;  %v1063_v10 = vld [vmem:[%s2221_s5] sm:$0xff] }
  0xea   : > { %v568_v32 = vsel %vm566_vm7, %v1432_v2, %v1437_v0  ;;  %v567_v35 = vsel %vm566_vm7, %v1431_v3, %v1436_v1  ;;  %v555_v36 = vpack.c.bf16 %v553_v21, %v551_v20  ;;  %v615_v37 = vrot.slane %v1259_v26, %v1805_v17  ;;  %1274 = vmatprep.mubr.msk.bf16.mxu1 %vm667_vm0, %v1456_v5 }
  0xeb   : > { %680 = vmatpush1.bf16.msra.mxu0 %v1784_v9  ;;  %v604_v38 = vsel %vm600_vm8, %v1447_v22, %v1442_v24  ;;  %v603_v9 = vsel %vm600_vm8, %v1446_v23, %v1441_v25  ;;  %v611_v39 = vrot.slane %v1259_v26, %v1807_v18  ;;  %v554_v40 = vpack.c.bf16 %v552_v29, %v550_v28 }
  0xec   : > { %681 = vmatprep.subr.bf16.mxu0 %v521_v11  ;;  %v589_v33 = vpack.c.bf16 %v587_v31, %v585_v30  ;;  %v584_v34 = vmul.f32 %v577_v8, %v567_v35  ;;  %v586_v43 = vmul.f32 %v577_v8, %v568_v32  ;;  %v602_v44 = vsel %vm600_vm8, %v1442_v24, %v1447_v22  ;;  %v1064_v11 = vld [vmem:[%s2221_s5 + $0x8] sm:$0xff]  ;;  %v795_v8 = vld [vmem:[%s2216_s0] sm:$0x3]  ;;  %v1265_v32 = vld [vmem:[%s2216_s0 + $0x2] sm:$0x3] }
  0xed   : > { %v601_v45 = vsel %vm600_vm8, %v1441_v25, %v1446_v23  ;;  %v619_v46 = vmul.f32 %v615_v37, %v603_v9  ;;  %v621_v47 = vmul.f32 %v615_v37, %v604_v38  ;;  %v620_v49 = vmul.f32 %v611_v39, %v602_v44 }
  0xee   : > { %v588_v41 = vpack.c.bf16 %v586_v43, %v584_v34  ;;  %v618_v48 = vmul.f32 %v611_v39, %v601_v45  ;;  %v800_v29 = vrot.slane %v795_v8, %v1807_v18  ;;  %v804_v30 = vrot.slane %v795_v8, %v1805_v17 }
  0xef   : > { %682 = vmatpush1.bf16.msra.mxu0 %v520_v27  ;;  %v623_v50 = vpack.c.bf16 %v621_v47, %v619_v46  ;;  %v832_v39 = vrot.slane %v1265_v32, %v1807_v18  ;;  %v1266_v46 = vld [vmem:[%s2216_s0 + $0x4] sm:$0x3] }
  0xf0   : > { %683 = vmatprep.subr.bf16.mxu0 %v555_v36  ;;  %v622_v51 = vpack.c.bf16 %v620_v49, %v618_v48 }
  0xf3   : > { %684 = vmatpush1.bf16.msra.mxu0 %v554_v40  ;;  %v836_v40 = vrot.slane %v1265_v32, %v1805_v17 }
  0xf4   : > { %685 = vmatprep.subr.bf16.mxu0 %v589_v33 }
  0xf7   : > { %686 = vmatpush1.bf16.msra.mxu0 %v588_v41 }
  0xf8   : > { %687 = vmatprep.subr.bf16.mxu0 %v623_v50 }
  0xf9   : > { %v651_v53 = vpop.permute.xlu0 %650  ;;  %v656_v55 = vpop.permute.xlu1 %655 }
  0xfb   : > { %688 = vmatpush1.bf16.msra.mxu0 %v622_v51 }
  0xfe   : > { %704 = vmatmul.mubr.bf16.vlgmr.msra.gmra.mrb[0].mxu0 %v1452_v52 }
 0x1d1   : > { %v705_v54 = vpop.f32.mrb[0].mxu0 }
 0x1d2   : > { %v706_v42 = vadd.f32 %v705_v54, %v651_v53  ;;  %v707_v56 = vpop.f32.mrb[1].mxu0  ;;  %v868_v54 = vrot.slane %v1266_v46, %v1805_v17 }
 0x1d3   : > { %v708_v57 = vadd.f32 %v707_v56, %v651_v53  ;;  %v709_v58 = vpop.f32.mrb[2].mxu0  ;;  %v864_v53 = vrot.slane %v1266_v46, %v1807_v18  ;;  %v1269_v46 = vld [vmem:[%s2216_s0 + $0xc] sm:$0x3] }
 0x1d4   : > { %v1927_v59 = vmax.f32 %v706_v42, 0.0  ;;  %v710_v60 = vadd.f32 %v709_v58, %v656_v55  ;;  %v711_v61 = vpop.f32.mrb[3].mxu0 }
 0x1d5   : > { %v712_v62 = vadd.f32 %v711_v61, %v656_v55  ;;  %v1933_v0 = vmax.f32 %v708_v57, 0.0 }
 0x1d6   : > { %v1929_v63 = vmax.f32 %v710_v60, 0.0  ;;  %783 = vrot.lane.b32.xlu1 %v1927_v59, %s1594_s10  ;;  %v1267_v60 = vld [vmem:[%s2216_s0 + $0x6] sm:$0x3] }
 0x1d7   : > { %v1935_v1 = vmax.f32 %v712_v62, 0.0 }
 0x1d8   : > { %785 = vrot.lane.b32.xlu0 %v1929_v63, %s1594_s10  ;;  %v911_v2 = vpack.c.bf16 %v1929_v63, %v1927_v59 }
 0x1d9   : > { %v912_v3 = vpack.c.bf16 %v1935_v1, %v1933_v0 }
 0x1da   : > { %815 = vrot.lane.b32.xlu1 %v1927_v59, %s1593_s26 }
 0x1dc   : > { %817 = vrot.lane.b32.xlu0 %v1929_v63, %s1593_s26 }
 0x1de   : > { %847 = vrot.lane.b32.xlu1 %v1927_v59, %s1595_s12 }
 0x1e0   : > { %849 = vrot.lane.b32.xlu0 %v1929_v63, %s1595_s12 }
 0x1e2   : > { %879 = vrot.lane.b32.xlu1 %v1927_v59, %s1596_s13 }
 0x1e4   : > { %881 = vrot.lane.b32.xlu0 %v1929_v63, %s1596_s13 }
 0x1e6   : > { %915 = vrot.lane.b32.xlu1 %v1927_v59, %s1597_s18 }
 0x1e8   : > { %917 = vrot.lane.b32.xlu0 %v1929_v63, %s1597_s18 }
 0x1ea   : > { %947 = vrot.lane.b32.xlu1 %v1927_v59, %s1598_s19 }
 0x1ec   : > { %949 = vrot.lane.b32.xlu0 %v1929_v63, %s1598_s19 }
 0x1ee   : > { %979 = vrot.lane.b32.xlu1 %v1927_v59, %s1599_s29 }
 0x1f0   : > { %981 = vrot.lane.b32.xlu0 %v1929_v63, %s1599_s29 }
 0x1f2   : > { %787 = vrot.lane.b32.xlu1 %v1933_v0, %s1594_s10 }
 0x1f4   : > { %789 = vrot.lane.b32.xlu0 %v1935_v1, %s1594_s10  ;;  %s326_s10 = sand.u32 1, %s1577_s28  }
 0x1f6   : > { %819 = vrot.lane.b32.xlu1 %v1933_v0, %s1593_s26 }
 0x1f8   : > { %821 = vrot.lane.b32.xlu0 %v1935_v1, %s1593_s26 }
 0x1fa   : > { %851 = vrot.lane.b32.xlu1 %v1933_v0, %s1595_s12 }
 0x1fc   : > { %853 = vrot.lane.b32.xlu0 %v1935_v1, %s1595_s12  ;;  %s1248_s12 = sshll.u32 %s326_s10, 5 }
 0x1fe   : > { %883 = vrot.lane.b32.xlu1 %v1933_v0, %s1596_s13 }
 0x200   : > { %885 = vrot.lane.b32.xlu0 %v1935_v1, %s1596_s13  ;;  %s328_s13 = scalar_lea.vmem [#allocation8], %s1248_s12 }
 0x202   : > { %1011 = vrot.lane.b32.xlu1 %v1927_v59, %s1600_s14 }
 0x204   : > { %1013 = vrot.lane.b32.xlu0 %v1929_v63, %s1600_s14 }
 0x206   : > { %919 = vrot.lane.b32.xlu1 %v1933_v0, %s1597_s18 }
 0x208   : > { %921 = vrot.lane.b32.xlu0 %v1935_v1, %s1597_s18  ;;  %s1156_s18 = sshll.u32 %s328_s13, 4  ;;  %s2167_s18 = int_to_ptr.vmem [resolvable:$true] %s1156_s18 }
 0x20a   : > { %951 = vrot.lane.b32.xlu1 %v1933_v0, %s1598_s19 }
 0x20c   : > { %953 = vrot.lane.b32.xlu0 %v1935_v1, %s1598_s19  ;;  %s1281_s19 = sshll.u32 %s1670_s9, 9  ;;  %s1515_s9 = scalar_lea.vmem %s2167_s18, 512 }
 0x20d   : > { %s2172_s23 = scalar_lea.hbm %s2224_s8, %s1281_s19  ;;  %p1516_p12 = scmp.ne.s32.totalorder %s2167_s18, %s1515_s9 }
 0x20e   : > { %983 = vrot.lane.b32.xlu1 %v1933_v0, %s1599_s29 }
 0x20f   : > { %p1517_p2 = pnand %p1516_p12, %p2240_p1 }
 0x210   : > { %985 = vrot.lane.b32.xlu0 %v1935_v1, %s1599_s29  ;;  %s2174_s29 = scalar_lea.sflag [#allocation5], %s326_s10 }
 0x211   : > { %p1518_p3 = pneg %p1517_p2 }
 0x212   : > { %1015 = vrot.lane.b32.xlu1 %v1933_v0, %s1600_s14  ;;  %v1270_v0 = vld [vmem:[%s2216_s0 + $0xe] sm:$0x3] }
 0x214   : > { %1017 = vrot.lane.b32.xlu0 %v1935_v1, %s1600_s14  ;;  %s1519_s14 = sshll.u32 %s1602_s20, 4  ;;  %s1520_s14 = int_to_ptr.vmem [resolvable:$false] %s1519_s14 }
 0x215   : > { %s1521_s22 = scalar_lea.vmem %s1520_s14, 1024  ;;  %p1522_p4 = scmp.lt.s32.totalorder %s2167_s18, %s1520_s14 }
 0x216   : > { %724 = vperm.xlu1 %1449, %v720_v6   ;;  %p1523_p7 = scmp.lt.s32.totalorder %s1521_s22, %s1515_s9 }
 0x218   : > { %729 = vperm.xlu0 %1448, %v721_v7   ;;  %p1524_p8 = por %p1523_p7, %p1522_p4 }
 0x21a   : > { %1067 = vperm.xlu1 %1449, %v1063_v10   ;;  %p1525_p11 = pnand %p1524_p8, %p1518_p3 }
 0x21c   : > { %1072 = vperm.xlu0 %1448, %v1064_v11   ;;  %v896_v11 = vrot.slane %v1267_v60, %v1807_v18 }
 0x248   : > { %v784_v12 = vpop.permute.xlu1 %783 }
 0x24a   : > { %v786_v13 = vpop.permute.xlu0 %785 }
 0x24c   : > { %v816_v14 = vpop.permute.xlu1 %815 }
 0x24e   : > { %v818_v15 = vpop.permute.xlu0 %817 }
 0x250   : > { %v848_v19 = vpop.permute.xlu1 %847 }
 0x252   : > { %v850_v20 = vpop.permute.xlu0 %849 }
 0x254   : > { %v880_v21 = vpop.permute.xlu1 %879 }
 0x256   : > { %v2020_v22 = vpop.permute.xlu0 %881 }
 0x258   : > { %v2022_v23 = vpop.permute.xlu1 %915 }
 0x25a   : > { %v2024_v24 = vpop.permute.xlu0 %917 }
 0x25c   : > { %v2026_v25 = vpop.permute.xlu1 %947 }
 0x25e   : > { %v2028_v26 = vpop.permute.xlu0 %949 }
 0x260   : > { %v2030_v27 = vpop.permute.xlu1 %979 }
 0x262   : > { %v2035_v28 = vpop.permute.xlu0 %981 }
 0x264   : > { %v788_v31 = vpop.permute.xlu1 %787 }
 0x265   : > { %v791_v35 = vsel %vm351_vm3, %v784_v12, %v788_v31  ;;  %v793_v36 = vsel %vm351_vm3, %v788_v31, %v784_v12  ;;  %v900_v12 = vrot.slane %v1267_v60, %v1805_v17 }
 0x266   : > { %v790_v37 = vpop.permute.xlu0 %789  ;;  %v807_v33 = vmul.f32 %v800_v29, %v793_v36  ;;  %v808_v34 = vmul.f32 %v804_v30, %v791_v35 }
 0x267   : > { %v792_v38 = vsel %vm351_vm3, %v786_v13, %v790_v37  ;;  %v794_v9 = vsel %vm351_vm3, %v790_v37, %v786_v13 }
 0x268   : > { %v809_v43 = vmul.f32 %v800_v29, %v794_v9  ;;  %v810_v44 = vmul.f32 %v804_v30, %v792_v38  ;;  %v820_v45 = vpop.permute.xlu1 %819 }
 0x269   : > { %v823_v47 = vsel %vm384_vm1, %v816_v14, %v820_v45  ;;  %v825_v41 = vsel %vm384_vm1, %v820_v45, %v816_v14 }
 0x26a   : > { %v811_v48 = vpack.c.bf16 %v809_v43, %v807_v33  ;;  %v822_v49 = vpop.permute.xlu0 %821  ;;  %v812_v50 = vpack.c.bf16 %v810_v44, %v808_v34  ;;  %v839_v55 = vmul.f32 %v832_v39, %v825_v41  ;;  %v840_v42 = vmul.f32 %v836_v40, %v823_v47 }
 0x26b   : > { %v824_v51 = vsel %vm384_vm1, %v818_v15, %v822_v49  ;;  %v826_v52 = vsel %vm384_vm1, %v822_v49, %v818_v15 }
 0x26c   : > { %v841_v56 = vmul.f32 %v832_v39, %v826_v52  ;;  %v842_v57 = vmul.f32 %v836_v40, %v824_v51  ;;  %1087 = vmatprep.subr.bf16.mxu1 %v812_v50  ;;  %v852_v58 = vpop.permute.xlu1 %851  ;;  %v964_v51 = vrot.slane %v1269_v46, %v1807_v18  ;;  %v968_v52 = vrot.slane %v1269_v46, %v1805_v17 }
 0x26d   : > { %v855_v61 = vsel %vm418_vm2, %v848_v19, %v852_v58  ;;  %v857_v62 = vsel %vm418_vm2, %v852_v58, %v848_v19  ;;  %1088 = vmatpush1.bf16.msra.mxu1 %v811_v48 }
 0x26e   : > { %v843_v4 = vpack.c.bf16 %v841_v56, %v839_v55  ;;  %v854_v5 = vpop.permute.xlu0 %853  ;;  %v844_v6 = vpack.c.bf16 %v842_v57, %v840_v42  ;;  %v871_v13 = vmul.f32 %v864_v53, %v857_v62  ;;  %v872_v14 = vmul.f32 %v868_v54, %v855_v61 }
 0x26f   : > { %v856_v7 = vsel %vm418_vm2, %v850_v20, %v854_v5  ;;  %v858_v10 = vsel %vm418_vm2, %v854_v5, %v850_v20  ;;  %v996_v61 = vrot.slane %v1270_v0, %v1807_v18  ;;  %v1000_v62 = vrot.slane %v1270_v0, %v1805_v17 }
 0x270   : > { %v873_v15 = vmul.f32 %v864_v53, %v858_v10  ;;  %v874_v8 = vmul.f32 %v868_v54, %v856_v7  ;;  %1089 = vmatprep.subr.bf16.mxu1 %v844_v6  ;;  %v884_v19 = vpop.permute.xlu1 %883 }
 0x271   : > { %v887_v29 = vsel %vm452_vm4, %v880_v21, %v884_v19  ;;  %v889_v30 = vsel %vm452_vm4, %v884_v19, %v880_v21  ;;  %1090 = vmatpush1.bf16.msra.mxu1 %v843_v4  ;;  %v1268_v21 = vld [vmem:[%s2216_s0 + $0xa] sm:$0x3] }
 0x272   : > { %v875_v31 = vpack.c.bf16 %v873_v15, %v871_v13  ;;  %v886_v32 = vpop.permute.xlu0 %885  ;;  %v876_v20 = vpack.c.bf16 %v874_v8, %v872_v14  ;;  %v903_v37 = vmul.f32 %v896_v11, %v889_v30  ;;  %v904_v38 = vmul.f32 %v900_v12, %v887_v29 }
 0x273   : > { %v888_v35 = vsel %vm452_vm4, %v2020_v22, %v886_v32  ;;  %v890_v36 = vsel %vm452_vm4, %v886_v32, %v2020_v22  ;;  %v932_v44 = vrot.slane %v1268_v21, %v1807_v18  ;;  %v936_v22 = vrot.slane %v1268_v21, %v1805_v17  ;;  %v1458_v21 = vld [vmem:[%s2220_s4] ss:$8 sps:$4 sm:$0xff]  }
 0x274   : > { %v905_v9 = vmul.f32 %v896_v11, %v890_v36  ;;  %v906_v39 = vmul.f32 %v900_v12, %v888_v35  ;;  %1091 = vmatprep.subr.bf16.mxu1 %v876_v20  ;;  %v1012_v40 = vpop.permute.xlu1 %1011 }
 0x275   : > { %1092 = vmatpush1.bf16.msra.mxu1 %v875_v31 }
 0x276   : > { %v907_v33 = vpack.c.bf16 %v905_v9, %v903_v37  ;;  %v2091_v34 = vpop.permute.xlu0 %1013  ;;  %v908_v43 = vpack.c.bf16 %v906_v39, %v904_v38 }
 0x278   : > { %1093 = vmatprep.subr.bf16.mxu1 %v908_v43  ;;  %v920_v45 = vpop.permute.xlu1 %919 }
 0x279   : > { %v923_v47 = vsel %vm498_vm5, %v2022_v23, %v920_v45  ;;  %v925_v41 = vsel %vm498_vm5, %v920_v45, %v2022_v23  ;;  %1094 = vmatpush1.bf16.msra.mxu1 %v907_v33 }
 0x27a   : > { %v922_v48 = vpop.permute.xlu0 %921  ;;  %1095 = vmatprep.subr.bf16.mxu1 %v912_v3  ;;  %v939_v53 = vmul.f32 %v932_v44, %v923_v47  ;;  %v940_v23 = vmul.f32 %v936_v22, %v925_v41 }
 0x27b   : > { %v924_v49 = vsel %vm498_vm5, %v2024_v24, %v922_v48  ;;  %v926_v50 = vsel %vm498_vm5, %v922_v48, %v2024_v24 }
 0x27c   : > { %v941_v54 = vmul.f32 %v932_v44, %v924_v49  ;;  %v942_v55 = vmul.f32 %v936_v22, %v926_v50  ;;  %v952_v42 = vpop.permute.xlu1 %951 }
 0x27d   : > { %v955_v1 = vsel %vm532_vm6, %v2026_v25, %v952_v42  ;;  %v957_v3 = vsel %vm532_vm6, %v952_v42, %v2026_v25  ;;  %1096 = vmatpush1.bf16.msra.mxu1 %v911_v2  ;;  %v1271_v2 = vld [vmem:[%s2216_s0 + $0x10] sm:$0x3] }
 0x27e   : > { %v943_v24 = vpack.c.bf16 %v941_v54, %v939_v53  ;;  %v954_v56 = vpop.permute.xlu0 %953  ;;  %v944_v57 = vpack.c.bf16 %v942_v55, %v940_v23  ;;  %v971_v25 = vmul.f32 %v964_v51, %v955_v1  ;;  %v972_v4 = vmul.f32 %v968_v52, %v957_v3 }
 0x27f   : > { %v956_v58 = vsel %vm532_vm6, %v2028_v26, %v954_v56  ;;  %v958_v60 = vsel %vm532_vm6, %v954_v56, %v2028_v26  ;;  %v1028_v14 = vrot.slane %v1271_v2, %v1807_v18  ;;  %v1032_v15 = vrot.slane %v1271_v2, %v1805_v17 }
 0x280   : > { %v973_v5 = vmul.f32 %v964_v51, %v956_v58  ;;  %v974_v59 = vmul.f32 %v968_v52, %v958_v60  ;;  %v984_v63 = vpop.permute.xlu1 %983  ;;  %1097 = vmatprep.subr.bf16.mxu1 %v944_v57 }
 0x281   : > { %v987_v6 = vsel %vm566_vm7, %v2030_v27, %v984_v63  ;;  %v989_v26 = vsel %vm566_vm7, %v984_v63, %v2030_v27  ;;  %1098 = vmatpush1.bf16.msra.mxu1 %v943_v24 }
 0x282   : > { %v975_v7 = vpack.c.bf16 %v973_v5, %v971_v25  ;;  %v986_v10 = vpop.permute.xlu0 %985  ;;  %v976_v11 = vpack.c.bf16 %v974_v59, %v972_v4  ;;  %v1003_v8 = vmul.f32 %v996_v61, %v987_v6  ;;  %v1004_v19 = vmul.f32 %v1000_v62, %v989_v26 }
 0x283   : > { %v988_v12 = vsel %vm566_vm7, %v2035_v28, %v986_v10  ;;  %v990_v13 = vsel %vm566_vm7, %v986_v10, %v2035_v28 }
 0x284   : > { %v1005_v29 = vmul.f32 %v996_v61, %v988_v12  ;;  %v1006_v27 = vmul.f32 %v1000_v62, %v990_v13  ;;  %v1016_v30 = vpop.permute.xlu1 %1015  ;;  %1099 = vmatprep.subr.bf16.mxu1 %v976_v11 }
 0x285   : > { %v1019_v31 = vsel %vm600_vm8, %v1012_v40, %v1016_v30  ;;  %v1021_v32 = vsel %vm600_vm8, %v1016_v30, %v1012_v40  ;;  %1100 = vmatpush1.bf16.msra.mxu1 %v975_v7 }
 0x286   : > { %v1007_v20 = vpack.c.bf16 %v1005_v29, %v1003_v8  ;;  %v1018_v35 = vpop.permute.xlu0 %1017  ;;  %v1008_v28 = vpack.c.bf16 %v1006_v27, %v1004_v19  ;;  %v1035_v36 = vmul.f32 %v1028_v14, %v1019_v31  ;;  %v1036_v37 = vmul.f32 %v1032_v15, %v1021_v32 }
 0x287   : > { %v1020_v17 = vsel %vm600_vm8, %v2091_v34, %v1018_v35  ;;  %v1022_v18 = vsel %vm600_vm8, %v1018_v35, %v2091_v34 }
 0x288   : > { %v1037_v38 = vmul.f32 %v1028_v14, %v1020_v17  ;;  %v1038_v9 = vmul.f32 %v1032_v15, %v1022_v18  ;;  %1101 = vmatprep.subr.bf16.mxu1 %v1008_v28 }
 0x289   : > { %1102 = vmatpush1.bf16.msra.mxu1 %v1007_v20 }
 0x28a   : > { %v1039_v39 = vpack.c.bf16 %v1037_v38, %v1035_v36  ;;  %v1040_v40 = vpack.c.bf16 %v1038_v9, %v1036_v37 }
 0x28c   : > { %1103 = vmatprep.subr.bf16.mxu1 %v1040_v40 }
 0x28d   : > { %1104 = vmatpush1.bf16.msra.mxu1 %v1039_v39 }
 0x290   : > { %1120 = vmatmul.mubr.bf16.vlgmr.msra.gmra.mrb[0].mxu1 %v1458_v21 }
 0x295   : > { %v725_v33 = vpop.permute.xlu1 %724 }
 0x297   : > { %v730_v43 = vpop.permute.xlu0 %729 }
 0x299   : > { %v1068_v16 = vpop.permute.xlu1 %1067 }
 0x29a   : > { %v1282_v44 = vadd.f32 %v1068_v16, %v725_v33 }
 0x29b   : > { %v1073_v34 = vpop.permute.xlu0 %1072 }
 0x29c   : > { %v1286_v45 = vadd.f32 %v1073_v34, %v730_v43 }
 0x363   : > { %v1121_v22 = vpop.f32.mrb[0].mxu1 }
 0x364   : > { %v1283_v46 = vadd.f32 %v1282_v44, %v1121_v22  ;;  %v1123_v47 = vpop.f32.mrb[1].mxu1 }
 0x365   : > { %v1285_v41 = vadd.f32 %v1282_v44, %v1123_v47  ;;  %v1125_v48 = vpop.f32.mrb[2].mxu1 }
 0x366   : > { %v1134_v49 = vmax.f32 %v1283_v46, 0.0  ;;  %v1287_v50 = vadd.f32 %v1286_v45, %v1125_v48  ;;  %v1127_v51 = vpop.f32.mrb[3].mxu1 }
 0x367   : > { %v1135_v52 = vmax.f32 %v1285_v41, 0.0  ;;  %v1289_v53 = vadd.f32 %v1286_v45, %v1127_v51 }
 0x368   : > { %1138 = vst [vmem:[%s328_s13] sm:$0xff] %v1134_v49  ;;  %v1136_v23 = vmax.f32 %v1287_v50, 0.0 }
 0x369   : > { %1139 = vst [vmem:[%s328_s13 + $0x8] sm:$0xff] %v1135_v52  ;;  %v1137_v54 = vmax.f32 %v1289_v53, 0.0 }
 0x36a   : > { %1140 = vst [vmem:[%s328_s13 + $0x10] sm:$0xff] %v1136_v23 }
 0x36b   : > { %1141 = vst [vmem:[%s328_s13 + $0x18] sm:$0xff] %v1137_v54 }
 0x36c   : > { %1528 = shalt.err (!%p1525_p11)
}
 0x36d   : > { %s1529_s24 = scalar_lea.hbm %s2172_s23, 512  ;;  %s1533_s12 = scalar_lea.hbm %s2224_s8, 1024 }
 0x36e   : > { %p1530_p13 = scmp.ne.s32.totalorder %s2172_s23, %s1529_s24  ;;  %p1534_p6 = scmp.lt.u32.totalorder %s2172_s23, %s2224_s8 }
 0x36f   : > { %p1535_p9 = scmp.lt.u32.totalorder %s1533_s12, %s1529_s24  ;;  %p1537_p12 = scmp.lt.u32.totalorder %s1529_s24, %s2172_s23 }
 0x370   : > { %p1531_p0 = pnand %p1530_p13, %p2240_p1 }
 0x371   : > { %p1536_p10 = por %p1535_p9, %p1534_p6 }
 0x372   : > { %p1532_p5 = pneg %p1531_p0 }
 0x373   : > { %p1538_p2 = por %p1537_p12, %p1536_p10 }
 0x375   : > { %p1539_p3 = pnand %p1538_p2, %p1532_p5 }
 0x377   : > { %1542 = shalt.err (!%p1539_p3)
}
 0x378   : > { %s1603_s25 = smov 256  }
 0x379   : > { %1302 = dma.vmem_to_hbm [thread:$0]  (%p2240_p1), %s2167_s18, 512, %s2172_s23, %s2174_s29, %s1603_s25, %s1603_s25, %s1593_s26  }
 0x37a PF: > { %p1319_p4 = scmp.ge.s32.totalorder %s1585_s30, 2  ;;  %s1171_s21 = sand.u32 1, %s1573_s27  }
 0x37b   : > { %p2241_p7 = scmp.ne.s32.totalorder %s2232_s16, 0  ;;  %s1172_s9 = scalar_lea.sflag [#allocation5], %s1171_s21 }
 0x37d   : > { %p1312_p8 = pnand %p1319_p4, %p2241_p7 }
 0x37f   : > { %1568 = dma.done.wait (!%p1312_p8), %s1172_s9, 512  }
 0x380   : > { %1570 = vsyncadd (!%p1312_p8), %s1172_s9, 4294966784  ;;  %s2242_s20 = sld [smem:[#allocation12_spill]]  ;;  %s2243_s29 = sld [smem:[#allocation13_spill]] }
 0x381   : > { %p20_p11 = scmp.ge.s32.totalorder %s1674_s11, 4   ;;  %s2244_s27 = smov %s1577_s28 }
 0x382   : > { %s2246_s30 = smov %s1674_s11 }
 0x383   :  { %22 = sbr.rel (!%p20_p11) target bundleno = 5 (0x5), region = 103 }
 0x386   : > { %s2245_s28 = smov %s2242_s20 }
 0x38a   :  { %1177 = vsyncpa [#allocation4], 1 }
 0x38b   :  { %1179 = vsyncpa [#allocation4 + $0x1], 1 }
 0x38c   :  { %1180 = vsyncpa [#allocation7], 1 }
 0x38d   :  { %1181 = vsyncpa [#allocation5], 1 }
 0x38e   :  { %1183 = vsyncpa [#allocation5 + $0x1], 1 }

</bundles_post_ra>
